<compile_context>
chip_gen: v6e
topology: v6e:2x2x1
jax: 0.10.0
libtpu: 0.0.40
codegen_flags: <defaults>
</compile_context>

<pallas_src>
import functools
import math

import jax
import jax.numpy as jnp
from jax.experimental import pallas as pl
from jax.experimental.pallas import tpu as pltpu


def _conv2_kernel(x_ref, w_ref, b_ref, o_ref, *, out_w, tile_rows):
    """One grid step: a (tile_rows, out_w) spatial tile of one image.

    x_ref : (1, LS, C1)    flattened H-padded pixel rows + 2-row halo slab
    w_ref : (9, C1, C2p)   merged conv3x3 (+conv1x1, +BN scale) weights
    b_ref : (1, C2p)       folded BatchNorm bias
    o_ref : (tile_rows*out_w, C2p)
    """
    thw = tile_rows * out_w

    # Output-column index, used to zero the taps that fall outside the image
    # on the left/right (width is NOT padded in the slab layout).
    wj = jax.lax.broadcasted_iota(jnp.int32, (thw, 1), 0) % out_w
    not_left_edge = (wj > 0)
    not_right_edge = (wj < out_w - 1)

    acc = None
    for dh in range(3):
        for dw in range(3):
            off = dh * out_w + dw               # static python int -> static slice
            v = x_ref[0, off:off + thw, :]      # (thw, C1) shifted view of slab
            if dw == 0:                         # reads column w-1: invalid at w==0
                v = v * not_left_edge.astype(v.dtype)
            elif dw == 2:                       # reads column w+1: invalid at w==W-1
                v = v * not_right_edge.astype(v.dtype)
            contrib = jnp.dot(v, w_ref[dh * 3 + dw],
                              preferred_element_type=jnp.float32)
            acc = contrib if acc is None else acc + contrib

    y = acc + b_ref[...]                        # BN scale already in weights
    o_ref[...] = (y * jax.nn.sigmoid(y)).astype(o_ref.dtype)   # SiLU


def _pick_tile_rows(H, W, target_pixels):
    """Rows of output per grid step; keeps tile_rows*W a multiple of 8."""
    th = max(1, min(H, max(1, target_pixels // W)))
    step = 8 // math.gcd(W, 8)
    return ((th + step - 1) // step) * step


@functools.partial(jax.jit, static_argnames=("target_pixels", "compute_dtype"))
def conv2_forward(x_nchw, w3_torch, w1_torch, bn_gamma, bn_beta,
                  bn_mean, bn_var, *, eps=1e-5, target_pixels=1024,
                  compute_dtype=jnp.float32):
    """Conv2.forward: SiLU(BN(conv3x3(x) + conv1x1(x))).  x is NCHW.

    `compute_dtype` can be set to jnp.bfloat16 on v6e/v7x for MXU throughput;
    all folds and the accumulate/epilogue stay in f32.
    """
    N, C1, H, W = x_nchw.shape
    C2 = w3_torch.shape[0]

    # -------- weight prep: fold conv1x1 + BN scale, pad C2 to lane width ----
    w33 = jnp.transpose(w3_torch.astype(jnp.float32), (2, 3, 1, 0))   # (3,3,C1,C2)
    w11 = jnp.transpose(w1_torch.astype(jnp.float32).reshape(C2, C1), (1, 0))
    w33 = w33.at[1, 1].add(w11)                                       # centre tap

    scale = bn_gamma.astype(jnp.float32) / jnp.sqrt(bn_var.astype(jnp.float32) + eps)
    bias = bn_beta.astype(jnp.float32) - bn_mean.astype(jnp.float32) * scale
    w33 = w33 * scale[None, None, None, :]                            # fold scale

    C2p = ((C2 + 127) // 128) * 128                                   # lane-dense
    w_merged = jnp.zeros((3, 3, C1, C2p), jnp.float32).at[..., :C2].set(w33)
    w_merged = w_merged.reshape(9, C1, C2p).astype(compute_dtype)
    bias_p = jnp.zeros((1, C2p), jnp.float32).at[0, :C2].set(bias)

    # -------- input prep: NCHW -> flattened H-padded pixel rows + halo ------
    th = _pick_tile_rows(H, W, target_pixels)
    num_hb = -(-H // th)                       # ceil(H / th)
    Hp = num_hb * th + 2                       # padded height (>= H + 2)
    thw = th * W
    LS = (th + 2) * W + 2                      # slab rows (incl. front/back dummy)

    x_nhwc = jnp.transpose(x_nchw, (0, 2, 3, 1))                      # (N,H,W,C1)
    xh = jnp.pad(x_nhwc, ((0, 0), (1, Hp - H - 1), (0, 0), (0, 0)))   # (N,Hp,W,C1)
    xflat = xh.reshape(N, Hp * W, C1)
    xflat = jnp.pad(xflat, ((0, 0), (1, 1), (0, 0)))                  # dummy rows

    # Halo slabs per (image, row-block): overlap is only 2 rows + 2 pixels.
    row0 = jnp.arange(num_hb, dtype=jnp.int32) * (th * W)
    idx = row0[:, None] + jnp.arange(LS, dtype=jnp.int32)[None, :]
    slabs = jnp.take(xflat, idx, axis=1)                  # (N, num_hb, LS, C1)
    slabs = slabs.reshape(N * num_hb, LS, C1).astype(compute_dtype)

    G = N * num_hb

    # -------- VMEM budget (double-buffered in/out + resident weights) -------
    isz = jnp.dtype(compute_dtype).itemsize
    est = (2 * LS * C1 * isz                     # input slab, double-buffered
           + 9 * C1 * C2p * isz                  # resident merged weights
           + 2 * thw * C2p * x_nchw.dtype.itemsize   # output, double-buffered
           + 4 * thw * C2p * 4)                  # f32 accumulator temporaries
    vmem_limit = int(min(max(4 * est, 32 << 20), 48 << 20))

    kernel = functools.partial(_conv2_kernel, out_w=W, tile_rows=th)
    out_flat = pl.pallas_call(
        kernel,
        out_shape=jax.ShapeDtypeStruct((G * thw, C2p), x_nchw.dtype),
        grid_spec=pltpu.PrefetchScalarGridSpec(
            num_scalar_prefetch=0,
            grid=(G,),
            in_specs=[
                pl.BlockSpec((1, LS, C1), lambda g: (g, 0, 0)),
                pl.BlockSpec((9, C1, C2p), lambda g: (0, 0, 0)),
                pl.BlockSpec((1, C2p), lambda g: (0, 0)),
            ],
            out_specs=pl.BlockSpec((thw, C2p), lambda g: (g, 0)),
        ),
        compiler_params=pltpu.CompilerParams(
            dimension_semantics=("parallel",),
            vmem_limit_bytes=vmem_limit),
    )(slabs, w_merged, bias_p)

    # (G*thw, C2p) -> (N, num_hb*th, W, C2p) -> crop ragged rows/channels -> NCHW
    out = out_flat.reshape(N, num_hb * th, W, C2p)[:, :H, :, :C2]
    return jnp.transpose(out, (0, 3, 1, 2))


def _reference(x, w3, w1, gamma, beta, mean, var, eps=1e-5):
    """Pure-JAX reference of Conv2.forward (eval-mode BN)."""
    dn = jax.lax.conv_dimension_numbers(x.shape, w3.shape,
                                        ("NCHW", "OIHW", "NCHW"))
    y3 = jax.lax.conv_general_dilated(x, w3, (1, 1), ((1, 1), (1, 1)),
                                      dimension_numbers=dn)
    y1 = jax.lax.conv_general_dilated(x, w1, (1, 1), ((0, 0), (0, 0)),
                                      dimension_numbers=dn)
    y = y3 + y1
    scale = (gamma / jnp.sqrt(var + eps))[None, :, None, None]
    bias = (beta - mean * gamma / jnp.sqrt(var + eps))[None, :, None, None]
    y = y * scale + bias
    return y * jax.nn.sigmoid(y)


if __name__ == "__main__":
    def run_case(key, N, C1, C2, H, W):
        kx, k3, k1, kg, kb, km, kv = jax.random.split(key, 7)
        x = jax.random.normal(kx, (N, C1, H, W), dtype=jnp.float32)
        bound3 = 1.0 / (C1 * 9) ** 0.5
        bound1 = 1.0 / (C1 * 1) ** 0.5
        w3 = jax.random.uniform(k3, (C2, C1, 3, 3), jnp.float32, -bound3, bound3)
        w1 = jax.random.uniform(k1, (C2, C1, 1, 1), jnp.float32, -bound1, bound1)
        gamma = jax.random.uniform(kg, (C2,), jnp.float32, 0.5, 1.5)
        beta = 0.1 * jax.random.normal(kb, (C2,), jnp.float32)
        mean = 0.1 * jax.random.normal(km, (C2,), jnp.float32)
        var = jax.random.uniform(kv, (C2,), jnp.float32, 0.5, 1.5)

        out = jax.block_until_ready(
            conv2_forward(x, w3, w1, gamma, beta, mean, var))
        ref = _reference(x, w3, w1, gamma, beta, mean, var)
        assert out.shape == (N, C2, H, W)
        assert jnp.allclose(out, ref, rtol=1e-4, atol=1e-4), "mismatch vs ref"

    key = jax.random.PRNGKey(0)
    k_a, k_b = jax.random.split(key)
    run_case(k_a, 2, 4, 8, 16, 16)   # Conv2(c1=4, c2=8, k=3, s=1)
    run_case(k_b, 1, 3, 6, 5, 7)     # ragged spatial / odd channel counts

    print("KERNEL_OK")
</pallas_src>

<mosaic_0001>
module attributes {stable_mosaic.version = 11 : i64} {
  func.func @_conv2_kernel(%arg0: i32, %arg1: memref<1x290x4xf32, #tpu.memory_space<vmem>>, %arg2: memref<9x4x128xf32, #tpu.memory_space<vmem>>, %arg3: memref<1x128xf32, #tpu.memory_space<vmem>>, %arg4: memref<256x128xf32, #tpu.memory_space<vmem>>) attributes {dimension_semantics = [#tpu.dimension_semantics<parallel>], iteration_bounds = array<i64: 2>, scalar_prefetch = 0 : i64, scratch_operands = 0 : i64, tpu.core_type = #tpu.core_type<tc>, window_params = [{transform_indices = @transform_0, window_bounds = array<i64: 1, 290, 4>}, {pipeline_mode = #tpu.pipeline_mode<synchronous>, transform_indices = @transform_1, window_bounds = array<i64: 9, 4, 128>}, {pipeline_mode = #tpu.pipeline_mode<synchronous>, transform_indices = @transform_2, window_bounds = array<i64: 1, 128>}, {transform_indices = @transform_3, window_bounds = array<i64: 256, 128>}]} {
    %0 = tpu.iota {dimensions = array<i32: 0>} : vector<256x1xi32>
    %c16_i32 = arith.constant 16 : i32
    %c0_i32 = arith.constant 0 : i32
    %1 = arith.cmpi eq, %c16_i32, %c0_i32 : i32
    %c1_i32 = arith.constant 1 : i32
    %2 = arith.select %1, %c1_i32, %c16_i32 : i32
    %3 = vector.broadcast %2 : i32 to vector<256x1xi32>
    %4 = arith.remsi %0, %3 : vector<256x1xi32>
    %c0_i32_0 = arith.constant 0 : i32
    %5 = vector.broadcast %c0_i32_0 : i32 to vector<256x1xi32>
    %6 = arith.cmpi ne, %4, %5 : vector<256x1xi32>
    %c0_i32_1 = arith.constant 0 : i32
    %7 = vector.broadcast %c0_i32_1 : i32 to vector<256x1xi32>
    %8 = arith.cmpi slt, %4, %7 : vector<256x1xi32>
    %c0_i32_2 = arith.constant 0 : i32
    %9 = arith.cmpi slt, %2, %c0_i32_2 : i32
    %10 = vector.broadcast %9 : i1 to vector<256x1xi1>
    %11 = vector.broadcast %10 : vector<256x1xi1> to vector<256x1xi1>
    %12 = arith.xori %8, %11 : vector<256x1xi1>
    %13 = arith.andi %12, %6 : vector<256x1xi1>
    %14 = vector.broadcast %2 : i32 to vector<256x1xi32>
    %15 = arith.addi %4, %14 : vector<256x1xi32>
    %16 = arith.select %13, %15, %4 : vector<256x1xi1>, vector<256x1xi32>
    %c0_i32_3 = arith.constant 0 : i32
    %17 = vector.broadcast %c0_i32_3 : i32 to vector<256x1xi32>
    %18 = arith.cmpi sgt, %16, %17 : vector<256x1xi32>
    %c15_i32 = arith.constant 15 : i32
    %19 = vector.broadcast %c15_i32 : i32 to vector<256x1xi32>
    %20 = arith.cmpi slt, %16, %19 : vector<256x1xi32>
    %c0 = arith.constant 0 : index
    %c0_4 = arith.constant 0 : index
    %c0_5 = arith.constant 0 : index
    %21 = vector.load %arg1[%c0, %c0_4, %c0_5] : memref<1x290x4xf32, #tpu.memory_space<vmem>>, vector<1x256x4xf32>
    %22 = vector.shape_cast %21 : vector<1x256x4xf32> to vector<256x4xf32>
    %23 = arith.extui %18 : vector<256x1xi1> to vector<256x1xi32>
    %24 = arith.sitofp %23 : vector<256x1xi32> to vector<256x1xf32>
    %25 = vector.broadcast %24 : vector<256x1xf32> to vector<256x4xf32>
    %26 = arith.mulf %22, %25 : vector<256x4xf32>
    %c0_6 = arith.constant 0 : index
    %c0_7 = arith.constant 0 : index
    %c0_8 = arith.constant 0 : index
    %27 = vector.load %arg2[%c0_6, %c0_7, %c0_8] : memref<9x4x128xf32, #tpu.memory_space<vmem>>, vector<1x4x128xf32>
    %28 = vector.shape_cast %27 : vector<1x4x128xf32> to vector<4x128xf32>
    %cst = arith.constant dense<0.000000e+00> : vector<256x128xf32>
    %29 = tpu.matmul %26, %28, %cst {dimension_numbers = #tpu.dot_dimension_numbers<[1], [0], [0], [1], [0, 0, 1, 1], [], []>} : vector<256x4xf32>, vector<4x128xf32>, vector<256x128xf32> -> vector<256x128xf32>
    %c0_9 = arith.constant 0 : index
    %c1 = arith.constant 1 : index
    %c0_10 = arith.constant 0 : index
    %30 = vector.load %arg1[%c0_9, %c1, %c0_10] : memref<1x290x4xf32, #tpu.memory_space<vmem>>, vector<1x256x4xf32>
    %31 = vector.shape_cast %30 : vector<1x256x4xf32> to vector<256x4xf32>
    %c1_11 = arith.constant 1 : index
    %c0_12 = arith.constant 0 : index
    %c0_13 = arith.constant 0 : index
    %32 = vector.load %arg2[%c1_11, %c0_12, %c0_13] : memref<9x4x128xf32, #tpu.memory_space<vmem>>, vector<1x4x128xf32>
    %33 = vector.shape_cast %32 : vector<1x4x128xf32> to vector<4x128xf32>
    %cst_14 = arith.constant dense<0.000000e+00> : vector<256x128xf32>
    %34 = tpu.matmul %31, %33, %cst_14 {dimension_numbers = #tpu.dot_dimension_numbers<[1], [0], [0], [1], [0, 0, 1, 1], [], []>} : vector<256x4xf32>, vector<4x128xf32>, vector<256x128xf32> -> vector<256x128xf32>
    %35 = arith.addf %29, %34 : vector<256x128xf32>
    %c0_15 = arith.constant 0 : index
    %c2 = arith.constant 2 : index
    %c0_16 = arith.constant 0 : index
    %36 = vector.load %arg1[%c0_15, %c2, %c0_16] : memref<1x290x4xf32, #tpu.memory_space<vmem>>, vector<1x256x4xf32>
    %37 = vector.shape_cast %36 : vector<1x256x4xf32> to vector<256x4xf32>
    %38 = arith.extui %20 : vector<256x1xi1> to vector<256x1xi32>
    %39 = arith.sitofp %38 : vector<256x1xi32> to vector<256x1xf32>
    %40 = vector.broadcast %39 : vector<256x1xf32> to vector<256x4xf32>
    %41 = arith.mulf %37, %40 : vector<256x4xf32>
    %c2_17 = arith.constant 2 : index
    %c0_18 = arith.constant 0 : index
    %c0_19 = arith.constant 0 : index
    %42 = vector.load %arg2[%c2_17, %c0_18, %c0_19] : memref<9x4x128xf32, #tpu.memory_space<vmem>>, vector<1x4x128xf32>
    %43 = vector.shape_cast %42 : vector<1x4x128xf32> to vector<4x128xf32>
    %cst_20 = arith.constant dense<0.000000e+00> : vector<256x128xf32>
    %44 = tpu.matmul %41, %43, %cst_20 {dimension_numbers = #tpu.dot_dimension_numbers<[1], [0], [0], [1], [0, 0, 1, 1], [], []>} : vector<256x4xf32>, vector<4x128xf32>, vector<256x128xf32> -> vector<256x128xf32>
    %45 = arith.addf %35, %44 : vector<256x128xf32>
    %c0_21 = arith.constant 0 : index
    %c16 = arith.constant 16 : index
    %c0_22 = arith.constant 0 : index
    %46 = vector.load %arg1[%c0_21, %c16, %c0_22] : memref<1x290x4xf32, #tpu.memory_space<vmem>>, vector<1x256x4xf32>
    %47 = vector.shape_cast %46 : vector<1x256x4xf32> to vector<256x4xf32>
    %48 = arith.extui %18 : vector<256x1xi1> to vector<256x1xi32>
    %49 = arith.sitofp %48 : vector<256x1xi32> to vector<256x1xf32>
    %50 = vector.broadcast %49 : vector<256x1xf32> to vector<256x4xf32>
    %51 = arith.mulf %47, %50 : vector<256x4xf32>
    %c3 = arith.constant 3 : index
    %c0_23 = arith.constant 0 : index
    %c0_24 = arith.constant 0 : index
    %52 = vector.load %arg2[%c3, %c0_23, %c0_24] : memref<9x4x128xf32, #tpu.memory_space<vmem>>, vector<1x4x128xf32>
    %53 = vector.shape_cast %52 : vector<1x4x128xf32> to vector<4x128xf32>
    %cst_25 = arith.constant dense<0.000000e+00> : vector<256x128xf32>
    %54 = tpu.matmul %51, %53, %cst_25 {dimension_numbers = #tpu.dot_dimension_numbers<[1], [0], [0], [1], [0, 0, 1, 1], [], []>} : vector<256x4xf32>, vector<4x128xf32>, vector<256x128xf32> -> vector<256x128xf32>
    %55 = arith.addf %45, %54 : vector<256x128xf32>
    %c0_26 = arith.constant 0 : index
    %c17 = arith.constant 17 : index
    %c0_27 = arith.constant 0 : index
    %56 = vector.load %arg1[%c0_26, %c17, %c0_27] : memref<1x290x4xf32, #tpu.memory_space<vmem>>, vector<1x256x4xf32>
    %57 = vector.shape_cast %56 : vector<1x256x4xf32> to vector<256x4xf32>
    %c4 = arith.constant 4 : index
    %c0_28 = arith.constant 0 : index
    %c0_29 = arith.constant 0 : index
    %58 = vector.load %arg2[%c4, %c0_28, %c0_29] : memref<9x4x128xf32, #tpu.memory_space<vmem>>, vector<1x4x128xf32>
    %59 = vector.shape_cast %58 : vector<1x4x128xf32> to vector<4x128xf32>
    %cst_30 = arith.constant dense<0.000000e+00> : vector<256x128xf32>
    %60 = tpu.matmul %57, %59, %cst_30 {dimension_numbers = #tpu.dot_dimension_numbers<[1], [0], [0], [1], [0, 0, 1, 1], [], []>} : vector<256x4xf32>, vector<4x128xf32>, vector<256x128xf32> -> vector<256x128xf32>
    %61 = arith.addf %55, %60 : vector<256x128xf32>
    %c0_31 = arith.constant 0 : index
    %c18 = arith.constant 18 : index
    %c0_32 = arith.constant 0 : index
    %62 = vector.load %arg1[%c0_31, %c18, %c0_32] : memref<1x290x4xf32, #tpu.memory_space<vmem>>, vector<1x256x4xf32>
    %63 = vector.shape_cast %62 : vector<1x256x4xf32> to vector<256x4xf32>
    %64 = arith.extui %20 : vector<256x1xi1> to vector<256x1xi32>
    %65 = arith.sitofp %64 : vector<256x1xi32> to vector<256x1xf32>
    %66 = vector.broadcast %65 : vector<256x1xf32> to vector<256x4xf32>
    %67 = arith.mulf %63, %66 : vector<256x4xf32>
    %c5 = arith.constant 5 : index
    %c0_33 = arith.constant 0 : index
    %c0_34 = arith.constant 0 : index
    %68 = vector.load %arg2[%c5, %c0_33, %c0_34] : memref<9x4x128xf32, #tpu.memory_space<vmem>>, vector<1x4x128xf32>
    %69 = vector.shape_cast %68 : vector<1x4x128xf32> to vector<4x128xf32>
    %cst_35 = arith.constant dense<0.000000e+00> : vector<256x128xf32>
    %70 = tpu.matmul %67, %69, %cst_35 {dimension_numbers = #tpu.dot_dimension_numbers<[1], [0], [0], [1], [0, 0, 1, 1], [], []>} : vector<256x4xf32>, vector<4x128xf32>, vector<256x128xf32> -> vector<256x128xf32>
    %71 = arith.addf %61, %70 : vector<256x128xf32>
    %c0_36 = arith.constant 0 : index
    %c32 = arith.constant 32 : index
    %c0_37 = arith.constant 0 : index
    %72 = vector.load %arg1[%c0_36, %c32, %c0_37] : memref<1x290x4xf32, #tpu.memory_space<vmem>>, vector<1x256x4xf32>
    %73 = vector.shape_cast %72 : vector<1x256x4xf32> to vector<256x4xf32>
    %74 = arith.extui %18 : vector<256x1xi1> to vector<256x1xi32>
    %75 = arith.sitofp %74 : vector<256x1xi32> to vector<256x1xf32>
    %76 = vector.broadcast %75 : vector<256x1xf32> to vector<256x4xf32>
    %77 = arith.mulf %73, %76 : vector<256x4xf32>
    %c6 = arith.constant 6 : index
    %c0_38 = arith.constant 0 : index
    %c0_39 = arith.constant 0 : index
    %78 = vector.load %arg2[%c6, %c0_38, %c0_39] : memref<9x4x128xf32, #tpu.memory_space<vmem>>, vector<1x4x128xf32>
    %79 = vector.shape_cast %78 : vector<1x4x128xf32> to vector<4x128xf32>
    %cst_40 = arith.constant dense<0.000000e+00> : vector<256x128xf32>
    %80 = tpu.matmul %77, %79, %cst_40 {dimension_numbers = #tpu.dot_dimension_numbers<[1], [0], [0], [1], [0, 0, 1, 1], [], []>} : vector<256x4xf32>, vector<4x128xf32>, vector<256x128xf32> -> vector<256x128xf32>
    %81 = arith.addf %71, %80 : vector<256x128xf32>
    %c0_41 = arith.constant 0 : index
    %c33 = arith.constant 33 : index
    %c0_42 = arith.constant 0 : index
    %82 = vector.load %arg1[%c0_41, %c33, %c0_42] : memref<1x290x4xf32, #tpu.memory_space<vmem>>, vector<1x256x4xf32>
    %83 = vector.shape_cast %82 : vector<1x256x4xf32> to vector<256x4xf32>
    %c7 = arith.constant 7 : index
    %c0_43 = arith.constant 0 : index
    %c0_44 = arith.constant 0 : index
    %84 = vector.load %arg2[%c7, %c0_43, %c0_44] : memref<9x4x128xf32, #tpu.memory_space<vmem>>, vector<1x4x128xf32>
    %85 = vector.shape_cast %84 : vector<1x4x128xf32> to vector<4x128xf32>
    %cst_45 = arith.constant dense<0.000000e+00> : vector<256x128xf32>
    %86 = tpu.matmul %83, %85, %cst_45 {dimension_numbers = #tpu.dot_dimension_numbers<[1], [0], [0], [1], [0, 0, 1, 1], [], []>} : vector<256x4xf32>, vector<4x128xf32>, vector<256x128xf32> -> vector<256x128xf32>
    %87 = arith.addf %81, %86 : vector<256x128xf32>
    %c0_46 = arith.constant 0 : index
    %c34 = arith.constant 34 : index
    %c0_47 = arith.constant 0 : index
    %88 = vector.load %arg1[%c0_46, %c34, %c0_47] : memref<1x290x4xf32, #tpu.memory_space<vmem>>, vector<1x256x4xf32>
    %89 = vector.shape_cast %88 : vector<1x256x4xf32> to vector<256x4xf32>
    %90 = arith.extui %20 : vector<256x1xi1> to vector<256x1xi32>
    %91 = arith.sitofp %90 : vector<256x1xi32> to vector<256x1xf32>
    %92 = vector.broadcast %91 : vector<256x1xf32> to vector<256x4xf32>
    %93 = arith.mulf %89, %92 : vector<256x4xf32>
    %c8 = arith.constant 8 : index
    %c0_48 = arith.constant 0 : index
    %c0_49 = arith.constant 0 : index
    %94 = vector.load %arg2[%c8, %c0_48, %c0_49] : memref<9x4x128xf32, #tpu.memory_space<vmem>>, vector<1x4x128xf32>
    %95 = vector.shape_cast %94 : vector<1x4x128xf32> to vector<4x128xf32>
    %cst_50 = arith.constant dense<0.000000e+00> : vector<256x128xf32>
    %96 = tpu.matmul %93, %95, %cst_50 {dimension_numbers = #tpu.dot_dimension_numbers<[1], [0], [0], [1], [0, 0, 1, 1], [], []>} : vector<256x4xf32>, vector<4x128xf32>, vector<256x128xf32> -> vector<256x128xf32>
    %97 = arith.addf %87, %96 : vector<256x128xf32>
    %c0_51 = arith.constant 0 : index
    %c0_52 = arith.constant 0 : index
    %98 = vector.load %arg3[%c0_51, %c0_52] : memref<1x128xf32, #tpu.memory_space<vmem>>, vector<1x128xf32>
    %99 = vector.broadcast %98 : vector<1x128xf32> to vector<256x128xf32>
    %100 = arith.addf %97, %99 : vector<256x128xf32>
    %101 = arith.negf %100 : vector<256x128xf32>
    %102 = math.exp %101 : vector<256x128xf32>
    %cst_53 = arith.constant 1.000000e+00 : f32
    %103 = vector.broadcast %cst_53 : f32 to vector<256x128xf32>
    %104 = arith.addf %103, %102 : vector<256x128xf32>
    %105 = arith.divf %103, %104 : vector<256x128xf32>
    %106 = arith.mulf %100, %105 : vector<256x128xf32>
    %c0_54 = arith.constant 0 : index
    %c0_55 = arith.constant 0 : index
    %107 = vector.load %arg4[%c0_54, %c0_55] : memref<256x128xf32, #tpu.memory_space<vmem>>, vector<256x128xf32>
    tpu.vector_store %arg4[%c0_54, %c0_55], %106 {strides = array<i32>} : memref<256x128xf32, #tpu.memory_space<vmem>>, vector<256x128xf32>,
    return
  }
  func.func @transform_0(%arg0: i32) -> (i32, i32, i32) {
    %c0_i32 = arith.constant 0 : i32
    %c0_i32_0 = arith.constant 0 : i32
    %c0_i32_1 = arith.constant 0 : i32
    return %arg0, %c0_i32, %c0_i32_0 : i32, i32, i32
  }
  func.func @transform_1(%arg0: i32) -> (i32, i32, i32) {
    %c0_i32 = arith.constant 0 : i32
    %c0_i32_0 = arith.constant 0 : i32
    %c0_i32_1 = arith.constant 0 : i32
    %c0_i32_2 = arith.constant 0 : i32
    return %c0_i32, %c0_i32_0, %c0_i32_1 : i32, i32, i32
  }
  func.func @transform_2(%arg0: i32) -> (i32, i32) {
    %c0_i32 = arith.constant 0 : i32
    %c0_i32_0 = arith.constant 0 : i32
    %c0_i32_1 = arith.constant 0 : i32
    return %c0_i32, %c0_i32_0 : i32, i32
  }
  func.func @transform_3(%arg0: i32) -> (i32, i32) {
    %c0_i32 = arith.constant 0 : i32
    %c0_i32_0 = arith.constant 0 : i32
    return %arg0, %c0_i32 : i32, i32
  }
}

</mosaic_0001>

<bundles_post_ra>
// kernel: conv2_forward.1
= control target key start
LH: loop header
LB: loop body
LE: loop exit
PB: predicated region body
PF: predicated region fallthrough
CT: control target
= control target key end

     0   :  { %s6067_s12 = smov 0   ;;  %s8064_s0 = inlined_call_operand.vmem [shape: f32[2,290,4], index: 0, kind: input, shape index: {}]   ;;  %s8065_s1 = inlined_call_operand.vmem [shape: f32[9,4,128], index: 1, kind: input, shape index: {}]   ;;  %s8066_s2 = inlined_call_operand.vmem [shape: f32[1,128], index: 2, kind: input, shape index: {}]   ;;  %s8067_s3 = inlined_call_operand.vmem [shape: f32[512,128], index: 3, kind: output, shape index: {}]  }
   0x1 LB: > { %s6073_s13 = sadd.s32 4294967295, %s6044_s12   ;;  %p4775_p0 = scmp.ge.s32.totalorder %s6044_s12, 1  ;;  %s6044_s12 = sphi %s6067_s12, %s13_s12  }
   0x2   : > { %p137_p1 = scmp.lt.s32.totalorder %s6044_s12, 3 }
   0x4   : > { %p138_p2 = pnand %p4775_p0, %p137_p1 }
   0x6   : > { %141 = sbr.rel (%p138_p2) target bundleno = 545 (0x221), region = 32 }
   0xb   : > { %v4795_v0 = vld [vmem:[%s8065_s1 + $0x4] sm:$0xf]  ;;  %vm913_vm0 = vcmask 1043456   ;;  %p161_p3 = scmp.lt.s32.totalorder %s6073_s13, 1  ;;  %v172_v1 = vlaneseq  ;;  %v781_v2 = vld [vmem:[%s8065_s1] sm:$0xf] }
   0xc   : > { %5898 = vmatprep.subr.msk.mxu1 %vm913_vm0, %v4795_v0  ;;  %5448 = vmatprep.subr.msk.mxu0 %vm913_vm0, %v4795_v0  ;;  %v4878_v3 = vld [vmem:[%s8065_s1 + $0x8] sm:$0xf]  ;;  %vm816_vm1 = vcmask 31744   ;;  %v6125_v12 = vld [vmem:[%s8065_s1 + $0xc] sm:$0xf]  ;;  %v8068_v27 = vmov 0.0  }
   0xd   : > { %5899 = vmatpush3.msk.msra.mxu1 %vm913_vm0, %v4795_v0  ;;  %5449 = vmatpush3.msk.msra.mxu0 %vm913_vm0, %v4795_v0  ;;  %s162_s20 = scalar_select %p161_p3, %s6073_s13, 1  ;;  %v6094_v4 = vshrl.u32 %v172_v1, 7  ;;  %v6130_v13 = vld [vmem:[%s8065_s1 + $0x10] sm:$0xf] }
   0xe   : > { %5498 = vmatprep.subr.msk.mxu1 %vm913_vm0, %v781_v2  ;;  %5548 = vmatprep.subr.msk.mxu0 %vm913_vm0, %v4878_v3  ;;  %s4777_s14 = sshll.u32 %s6073_s13, 5 }
   0xf   : > { %s5900_s21 = smul.u32 296, %s162_s20  ;;  %v174_v11 = vadd.s32 8, %v6094_v4  ;;  %v209_v35 = vand.u32 15, %v6094_v4  ;;  %v175_v36 = vadd.s32 16, %v6094_v4  ;;  %v176_v41 = vadd.s32 24, %v6094_v4  ;;  %p7856_p4 = scmp.lt.s32.totalorder %s4777_s14, 63 }
  0x10   : > { %v177_v42 = vadd.s32 32, %v6094_v4  ;;  %v178_v46 = vadd.s32 40, %v6094_v4  ;;  %v179_v53 = vadd.s32 48, %v6094_v4  ;;  %v180_v59 = vadd.s32 56, %v6094_v4 }
  0x11   : > { %s6099_s24 = scalar_lea.vmem %s8064_s0, %s5900_s21  ;;  %v216_v18 = vand.u32 15, %v174_v11  ;;  %vm589_vm3 = vcmp.gt.s32.totalorder %v209_v35, 0  ;;  %v223_v43 = vand.u32 15, %v175_v36  ;;  %v230_v51 = vand.u32 15, %v176_v41  ;;  %s8403_s14 = smov (!%p7856_p4, %s4777_s14), 63 }
  0x12   : > { %v782_v5 = vld [vmem:[%s6099_s24 + $0x1] sm:$0xff]  ;;  %v783_v7 = vld [vmem:[%s6099_s24 + $0x9] sm:$0xff]  ;;  %v6113_v9 = vld [vmem:[%s6099_s24 + $0x11] sm:$0xff]  ;;  %v6271_v50 = vsel %vm589_vm3, 1.0, %v8068_v27  ;;  %v237_v52 = vand.u32 15, %v177_v42  ;;  %v244_v58 = vand.u32 15, %v178_v46 }
  0x13   : > { %v6103_v6 = vld [vmem:[%s6099_s24 + $0x81] sm:$0xff]  ;;  %5450 = vmatprep.mubr.msk.f32.mxu0 %vm816_vm1, %v782_v5  ;;  %v6110_v8 = vld [vmem:[%s6099_s24 + $0x89] sm:$0xff]  ;;  %v6116_v10 = vld [vmem:[%s6099_s24 + $0x91] sm:$0xff]  ;;  %vm622_vm2 = vcmp.lt.s32.totalorder %v216_v18, 15  ;;  %vm591_vm4 = vcmp.gt.s32.totalorder %v223_v43, 0  ;;  %vm624_vm5 = vcmp.lt.s32.totalorder %v230_v51, 15 }
  0x14   : > { %5474 = vmatprep.mubr.msk.f32.mxu1 %vm816_vm1, %v6103_v6  ;;  %8148 = vst [vmem:[#allocation2_spill] sm:$0xff] %v6110_v8  ;;  %8149 = vst [vmem:[#allocation3_spill] sm:$0xff] %v6116_v10  ;;  %5451 = vmatmul.mubr.msk.f32.vlgmr.msra.gmra.mxu0 %vm816_vm1, %v783_v7  ;;  %v6135_v14 = vld [vmem:[%s6099_s24 + $0x19] sm:$0xff]  ;;  %v6145_v16 = vld [vmem:[%s6099_s24 + $0x21] sm:$0xff]  ;;  %v6195_v28 = vsel %vm622_vm2, 1.0, %v8068_v27  ;;  %v6296_v62 = vsel %vm591_vm4, 1.0, %v8068_v27 }
  0x15   : > { %5475 = vmatmul.mubr.msk.f32.vlgmr.msra.gmra.mxu1 %vm816_vm1, %v6110_v8  ;;  %5549 = vmatpush3.msk.msra.mxu0 %vm913_vm0, %v4878_v3  ;;  %v6138_v15 = vld [vmem:[%s6099_s24 + $0x99] sm:$0xff]  ;;  %v6148_v17 = vld [vmem:[%s6099_s24 + $0xa1] sm:$0xff]  ;;  %v6163_v19 = vld [vmem:[%s6099_s24 + $0x29] sm:$0xff]  ;;  %vm6298_vm6 = vcmp.gt.s32.totalorder %v237_v52, 0  ;;  %v251_v0 = vand.u32 15, %v179_v53  ;;  %v181_v1 = vadd.s32 64, %v6094_v4 }
  0x16   : > { %5499 = vmatpush3.msk.msra.mxu1 %vm913_vm0, %v781_v2  ;;  %8150 = vst [vmem:[#allocation4_spill] sm:$0xff] %v6138_v15  ;;  %5453 = vmatprep.mubr.msk.f32.mxu0 %vm816_vm1, %v6113_v9  ;;  %8151 = vst [vmem:[#allocation5_spill] sm:$0xff] %v6148_v17  ;;  %v6166_v20 = vld [vmem:[%s6099_s24 + $0xa9] sm:$0xff]  ;;  %v6169_v21 = vld [vmem:[%s6099_s24 + $0x31] sm:$0xff]  ;;  %v182_v3 = vadd.s32 72, %v6094_v4  ;;  %v6316_v11 = vsel %vm624_vm5, 1.0, %v8068_v27 }
  0x17   : > { %5477 = vmatprep.mubr.msk.f32.mxu1 %vm816_vm1, %v6116_v10  ;;  %5598 = vmatprep.subr.msk.mxu1 %vm913_vm0, %v6125_v12  ;;  %8152 = vst [vmem:[#allocation6_spill] sm:$0xff] %v6166_v20  ;;  %v6172_v22 = vld [vmem:[%s6099_s24 + $0xb1] sm:$0xff]  ;;  %v6183_v23 = vld [vmem:[%s6099_s24 + $0x39] sm:$0xff]  ;;  %v6189_v25 = vld [vmem:[%s6099_s24 + $0x41] sm:$0xff]  ;;  %vm626_vm7 = vcmp.lt.s32.totalorder %v244_v58, 15  ;;  %v258_v18 = vand.u32 15, %v180_v59 }
  0x18   : > { %5648 = vmatprep.subr.msk.mxu0 %vm913_vm0, %v6130_v13  ;;  %5454 = vmatmul.mubr.msk.f32.gmra.mxu0 %vm816_vm1, %v6135_v14  ;;  %8153 = vst [vmem:[#allocation7_spill] sm:$0xff] %v6172_v22  ;;  %v6186_v24 = vld [vmem:[%s6099_s24 + $0xb9] sm:$0xff]  ;;  %v6192_v26 = vld [vmem:[%s6099_s24 + $0xc1] sm:$0xff]  ;;  %v6198_v29 = vld [vmem:[%s6099_s24 + $0x2a] sm:$0xff]  ;;  %v183_v35 = vadd.s32 80, %v6094_v4  ;;  %v6327_v42 = vsel %vm6298_vm6, 1.0, %v8068_v27 }
  0x19   : > { %5478 = vmatmul.mubr.msk.f32.gmra.mxu1 %vm816_vm1, %v6138_v15  ;;  %5456 = vmatprep.mubr.msk.f32.mxu0 %vm816_vm1, %v6145_v16  ;;  %8154 = vst [vmem:[#allocation8_spill] sm:$0xff] %v6186_v24  ;;  %8155 = vst [vmem:[#allocation9_spill] sm:$0xff] %v6192_v26  ;;  %v6202_v30 = vmul.f32 %v6195_v28, %v6198_v29  ;;  %v6213_v31 = vld [vmem:[%s6099_s24 + $0x49] sm:$0xff]  ;;  %v6219_v33 = vld [vmem:[%s6099_s24 + $0x51] sm:$0xff]  ;;  %vm6332_vm8 = vcmp.gt.s32.totalorder %v251_v0, 0  ;;  %v6341_v52 = vsel %vm626_vm7, 1.0, %v8068_v27 }
  0x1a   : > { %5480 = vmatprep.mubr.msk.f32.mxu1 %vm816_vm1, %v6148_v17  ;;  %8156 = vst [vmem:[#allocation10_spill] sm:$0xff] %v6198_v29  ;;  %v6216_v32 = vld [vmem:[%s6099_s24 + $0xc9] sm:$0xff]  ;;  %v6222_v34 = vld [vmem:[%s6099_s24 + $0xd1] sm:$0xff]  ;;  %v6235_v37 = vld [vmem:[%s6099_s24 + $0x59] sm:$0xff]  ;;  %v272_v53 = vand.u32 15, %v182_v3  ;;  %vm628_vm9 = vcmp.lt.s32.totalorder %v258_v18, 15  ;;  %v1567_v3 = vmul.f32 %v6341_v52, %v6198_v29 }
  0x1b   : > { %8157 = vst [vmem:[#allocation11_spill] sm:$0xff] %v6202_v30  ;;  %8158 = vst [vmem:[#allocation12_spill] sm:$0xff] %v6216_v32  ;;  %v6238_v38 = vld [vmem:[%s6099_s24 + $0xd9] sm:$0xff]  ;;  %v6241_v39 = vld [vmem:[%s6099_s24 + $0x61] sm:$0xff]  ;;  %v184_v63 = vadd.s32 88, %v6094_v4  ;;  %v199_v15 = vadd.s32 208, %v6094_v4 }
  0x1c   : > { %5457 = vmatmul.mubr.msk.f32.gmra.mxu0 %vm816_vm1, %v6163_v19  ;;  %8159 = vst [vmem:[#allocation13_spill] sm:$0xff] %v6222_v34  ;;  %8160 = vst [vmem:[#allocation14_spill] sm:$0xff] %v6238_v38  ;;  %v6244_v40 = vld [vmem:[%s6099_s24 + $0xe1] sm:$0xff]  ;;  %v6257_v44 = vld [vmem:[%s6099_s24 + $0x69] sm:$0xff]  ;;  %vm6394_vm11 = vcmp.lt.s32.totalorder %v272_v53, 15  ;;  %v201_v8 = vadd.s32 224, %v6094_v4 }
  0x1d   : > { %5481 = vmatmul.mubr.msk.f32.gmra.mxu1 %vm816_vm1, %v6166_v20  ;;  %5459 = vmatprep.mubr.msk.f32.mxu0 %vm816_vm1, %v6169_v21  ;;  %8161 = vst [vmem:[#allocation15_spill] sm:$0xff] %v6244_v40  ;;  %v6260_v45 = vld [vmem:[%s6099_s24 + $0xe9] sm:$0xff]  ;;  %v6264_v47 = vld [vmem:[%s6099_s24 + $0x71] sm:$0xff]  ;;  %v653_v49 = vld [vmem:[%s6099_s24] sm:$0xff]  ;;  %s4778_s13 = sshll.u32 %s8403_s14, 3 }
  0x1e   : > { %5483 = vmatprep.mubr.msk.f32.mxu1 %vm816_vm1, %v6172_v22  ;;  %8162 = vst [vmem:[#allocation16_spill] sm:$0xff] %v6260_v45  ;;  %v6267_v48 = vld [vmem:[%s6099_s24 + $0xf1] sm:$0xff]  ;;  %v6283_v54 = vld [vmem:[%s6099_s24 + $0x79] sm:$0xff]  ;;  %v749_v56 = vmul.f32 %v6271_v50, %v653_v49  ;;  %v1466_v60 = vld [vmem:[%s6099_s24 + $0x2] sm:$0xff]  ;;  %v265_v49 = vand.u32 15, %v181_v1  ;;  %v185_v1 = vadd.s32 96, %v6094_v4  ;;  %s7913_s18 = scalar_lea.vmem %s8067_s3, %s4778_s13 }
  0x1f   : > { %8163 = vst [vmem:[#allocation17_spill] sm:$0xff] %v6267_v48  ;;  %v6286_v55 = vld [vmem:[%s6099_s24 + $0xf9] sm:$0xff]  ;;  %v1467_v57 = vld [vmem:[%s6099_s24 + $0xa] sm:$0xff]  ;;  %8167 = vst [vmem:[#allocation19_spill] sm:$0xff] %v6316_v11  ;;  %v197_v22 = vadd.s32 192, %v6094_v4 }
  0x20   : > { %5460 = vmatmul.mubr.msk.f32.gmra.mxu0 %vm816_vm1, %v6183_v23  ;;  %8164 = vst [vmem:[#allocation18_spill] sm:$0xff] %v6286_v55  ;;  %v6293_v61 = vld [vmem:[%s6099_s24 + $0x10] sm:$0xff]  ;;  %v1563_v2 = vmul.f32 %v6195_v28, %v1467_v57  ;;  %v654_v5 = vld [vmem:[%s6099_s24 + $0x8] sm:$0xff]  ;;  %v6313_v7 = vld [vmem:[%s6099_s24 + $0x1a] sm:$0xff]  ;;  %vm6378_vm10 = vcmp.gt.s32.totalorder %v265_v49, 0  ;;  %v286_v49 = vand.u32 15, %v184_v63 }
  0x21   : > { %5484 = vmatmul.mubr.msk.f32.gmra.mxu1 %vm816_vm1, %v6186_v24  ;;  %5462 = vmatprep.mubr.msk.f32.mxu0 %vm816_vm1, %v6189_v25  ;;  %v751_v36 = vmul.f32 %v6296_v62, %v6293_v61  ;;  %v6322_v41 = vld [vmem:[%s6099_s24 + $0x20] sm:$0xff]  ;;  %v6330_v43 = vld [vmem:[%s6099_s24 + $0x12] sm:$0xff]  ;;  %v1565_v51 = vmul.f32 %v6316_v11, %v6313_v7  ;;  %8171 = vst [vmem:[#allocation21_spill] sm:$0xff] %v6341_v52  ;;  %v293_v52 = vand.u32 15, %v185_v1  ;;  %v6444_v11 = vld [vmem:[%s6099_s24 + $0x4a] sm:$0xff]  ;;  %v377_v17 = vand.u32 15, %v197_v22 }
  0x22   : > { %5486 = vmatprep.mubr.msk.f32.mxu1 %vm816_vm1, %v6192_v26  ;;  %8168 = vst [vmem:[#allocation20_spill] sm:$0xff] %v6330_v43  ;;  %v6351_v57 = vld [vmem:[%s8065_s1 + $0x18] sm:$0xf]  ;;  %v753_v59 = vmul.f32 %v6327_v42, %v6322_v41  ;;  %v6367_v0 = vld [vmem:[%s6099_s24 + $0x22] sm:$0xff]  ;;  %8182 = vst [vmem:[#allocation27_spill] sm:$0xff] %v6444_v11  ;;  %vm6446_vm13 = vcmp.lt.s32.totalorder %v286_v49, 15  ;;  %v6463_v49 = vmul.f32 %v6271_v50, %v6322_v41 }
  0x23   : > { %v6358_v58 = vld [vmem:[%s6099_s24 + $0x18] sm:$0xff]  ;;  %8172 = vst [vmem:[#allocation22_spill] sm:$0xff] %v6367_v0  ;;  %v6452_v29 = vld [vmem:[%s6099_s24 + $0x42] sm:$0xff]  ;;  %vm6457_vm14 = vcmp.gt.s32.totalorder %v293_v52, 0  ;;  %v189_v52 = vadd.s32 128, %v6094_v4  ;;  %v6594_v26 = vld [vmem:[%s6099_s24 + $0x90] sm:$0xff] }
  0x24   : > { %5463 = vmatmul.mubr.msk.f32.gmra.mxu0 %vm816_vm1, %v6213_v31  ;;  %v6407_v46 = vld [vmem:[%s6099_s24 + $0x3a] sm:$0xff]  ;;  %v6411_v53 = vld [vmem:[%s6099_s24 + $0x32] sm:$0xff]  ;;  %8185 = vst [vmem:[#allocation28_spill] sm:$0xff] %v6452_v29  ;;  %8188 = vst [vmem:[#allocation29_spill] sm:$0xff] %v6463_v49 }
  0x25   : > { %5487 = vmatmul.mubr.msk.f32.gmra.mxu1 %vm816_vm1, %v6216_v32  ;;  %5465 = vmatprep.mubr.msk.f32.mxu0 %vm816_vm1, %v6219_v33  ;;  %8178 = vst [vmem:[#allocation24_spill] sm:$0xff] %v6407_v46  ;;  %8179 = vst [vmem:[#allocation25_spill] sm:$0xff] %v6411_v53  ;;  %v6439_v1 = vld [vmem:[%s6099_s24 + $0x38] sm:$0xff]  ;;  %v195_v32 = vadd.s32 176, %v6094_v4  ;;  %v6628_v20 = vld [vmem:[%s6099_s24 + $0xa0] sm:$0xff] }
  0x26   : > { %5489 = vmatprep.mubr.msk.f32.mxu1 %vm816_vm1, %v6222_v34  ;;  %8210 = vst [vmem:[#allocation51_spill] sm:$0xff] %v6628_v20  ;;  %v6662_v10 = vld [vmem:[%s6099_s24 + $0xb0] sm:$0xff] }
  0x27   : > { %v363_v24 = vand.u32 15, %v195_v32  ;;  %8216 = vst [vmem:[#allocation57_spill] sm:$0xff] %v6662_v10 }
  0x28   : > { %5466 = vmatmul.mubr.msk.f32.gmra.mxu0 %vm816_vm1, %v6235_v37 }
  0x29   : > { %5490 = vmatmul.mubr.msk.f32.gmra.mxu1 %vm816_vm1, %v6238_v38  ;;  %5468 = vmatprep.mubr.msk.f32.mxu0 %vm816_vm1, %v6241_v39  ;;  %v6560_v38 = vld [vmem:[%s6099_s24 + $0x80] sm:$0xff] }
  0x2a   : > { %5492 = vmatprep.mubr.msk.f32.mxu1 %vm816_vm1, %v6244_v40  ;;  %v193_v40 = vadd.s32 160, %v6094_v4 }
  0x2c   : > { %5469 = vmatmul.mubr.msk.f32.gmra.mxu0 %vm816_vm1, %v6257_v44  ;;  %v349_v34 = vand.u32 15, %v193_v40 }
  0x2d   : > { %5493 = vmatmul.mubr.msk.f32.gmra.mxu1 %vm816_vm1, %v6260_v45  ;;  %5471 = vmatprep.mubr.msk.f32.mxu0 %vm816_vm1, %v6264_v47 }
  0x2e   : > { %5495 = vmatprep.mubr.msk.f32.mxu1 %vm816_vm1, %v6267_v48 }
  0x30   : > { %5472 = vmatmul.mubr.msk.f32.gmra.mxu0 %vm816_vm1, %v6283_v54 }
  0x31   : > { %5496 = vmatmul.mubr.msk.f32.gmra.mxu1 %vm816_vm1, %v6286_v55  ;;  %5550 = vmatprep.mubr.msk.f32.mxu0 %vm816_vm1, %v1466_v60  ;;  %v279_v60 = vand.u32 15, %v183_v35  ;;  %v6402_v35 = vld [vmem:[%s6099_s24 + $0x28] sm:$0xff] }
  0x32   : > { %5500 = vmatprep.mubr.msk.f32.mxu1 %vm816_vm1, %v749_v56  ;;  %v6346_v56 = vld [vmem:[%s8065_s1 + $0x14] sm:$0xf] }
  0x33   : > { %vm599_vm12 = vcmp.gt.s32.totalorder %v279_v60, 0 }
  0x34   : > { %5551 = vmatmul.mubr.msk.f32.vlgmr.msra.gmra.mxu0 %vm816_vm1, %v1563_v2 }
  0x35   : > { %5501 = vmatmul.mubr.msk.f32.vlgmr.msra.gmra.mxu1 %vm816_vm1, %v654_v5  ;;  %5649 = vmatpush3.msk.msra.mxu0 %vm913_vm0, %v6130_v13  ;;  %v6375_v13 = vsel %vm6332_vm8, 1.0, %v8068_v27  ;;  %v6392_v5 = vsel %vm628_vm9, 1.0, %v8068_v27  ;;  %v6414_v27 = vld [vmem:[%s6099_s24 + $0x40] sm:$0xff]  ;;  %vm609_vm8 = vcmp.gt.s32.totalorder %v349_v34, 0 }
  0x36   : > { %5599 = vmatpush3.msk.msra.mxu1 %vm913_vm0, %v6125_v12  ;;  %5503 = vmatprep.mubr.msk.f32.mxu1 %vm816_vm1, %v751_v36  ;;  %v6370_v12 = vld [vmem:[%s6099_s24 + $0x30] sm:$0xff]  ;;  %8175 = vst [vmem:[#allocation23_spill] sm:$0xff] %v6392_v5  ;;  %v1569_v60 = vmul.f32 %v6392_v5, %v6407_v46  ;;  %v188_v46 = vadd.s32 120, %v6094_v4  ;;  %v6476_v48 = vmul.f32 %v6327_v42, %v6414_v27  ;;  %v190_v5 = vadd.s32 136, %v6094_v4  ;;  %v6639_v34 = vld [vmem:[%s6099_s24 + $0x9a] sm:$0xff] }
  0x37   : > { %5553 = vmatprep.mubr.msk.f32.mxu0 %vm816_vm1, %v6330_v43  ;;  %5698 = vmatprep.subr.msk.mxu1 %vm913_vm0, %v6346_v56  ;;  %v755_v36 = vmul.f32 %v6375_v13, %v6370_v12  ;;  %v6467_v43 = vmul.f32 %v6195_v28, %v6313_v7  ;;  %v6488_v7 = vld [vmem:[%s6099_s24 + $0x60] sm:$0xff]  ;;  %8211 = vst [vmem:[#allocation52_spill] sm:$0xff] %v6639_v34 }
  0x38   : > { %5748 = vmatprep.subr.msk.mxu0 %vm913_vm0, %v6351_v57  ;;  %5554 = vmatmul.mubr.msk.f32.gmra.mxu0 %vm816_vm1, %v1565_v51  ;;  %v186_v51 = vadd.s32 104, %v6094_v4  ;;  %8191 = vst [vmem:[#allocation32_spill] sm:$0xff] %v6476_v48  ;;  %v6499_v48 = vld [vmem:[%s6099_s24 + $0x5a] sm:$0xff] }
  0x39   : > { %5504 = vmatmul.mubr.msk.f32.gmra.mxu1 %vm816_vm1, %v6358_v58  ;;  %5556 = vmatprep.mubr.msk.f32.mxu0 %vm816_vm1, %v6367_v0  ;;  %v187_v0 = vadd.s32 112, %v6094_v4  ;;  %8189 = vst [vmem:[#allocation30_spill] sm:$0xff] %v6467_v43  ;;  %8193 = vst [vmem:[#allocation34_spill] sm:$0xff] %v6499_v48  ;;  %v191_v43 = vadd.s32 144, %v6094_v4 }
  0x3a   : > { %5506 = vmatprep.mubr.msk.f32.mxu1 %vm816_vm1, %v753_v59  ;;  %v8180_v59 = vmov 0.0   ;;  %v300_v18 = vand.u32 15, %v186_v51  ;;  %v6471_v51 = vmul.f32 %v6296_v62, %v6370_v12 }
  0x3b   : > { %v6419_v30 = vsel %vm6378_vm10, 1.0, %v8180_v59  ;;  %v6430_v63 = vsel %vm6394_vm11, 1.0, %v8180_v59  ;;  %v6433_v2 = vsel %vm599_vm12, 1.0, %v8180_v59  ;;  %v307_v55 = vand.u32 15, %v187_v0  ;;  %v6494_v0 = vld [vmem:[%s6099_s24 + $0x48] sm:$0xff] }
  0x3c   : > { %5557 = vmatmul.mubr.msk.f32.gmra.mxu0 %vm816_vm1, %v1567_v3  ;;  %8181 = vst [vmem:[#allocation26_spill] sm:$0xff] %v6430_v63  ;;  %v757_v3 = vmul.f32 %v6419_v30, %v6414_v27  ;;  %8190 = vst [vmem:[#allocation31_spill] sm:$0xff] %v6471_v51  ;;  %v1571_v28 = vmul.f32 %v6430_v63, %v6444_v11  ;;  %v6511_v63 = vld [vmem:[%s6099_s24 + $0x52] sm:$0xff]  ;;  %vm634_vm15 = vcmp.lt.s32.totalorder %v300_v18, 15  ;;  %v314_v11 = vand.u32 15, %v188_v46  ;;  %v6537_v18 = vld [vmem:[%s6099_s24 + $0x6a] sm:$0xff] }
  0x3d   : > { %5507 = vmatmul.mubr.msk.f32.gmra.mxu1 %vm816_vm1, %v6402_v35  ;;  %5559 = vmatprep.mubr.msk.f32.mxu0 %vm816_vm1, %v6411_v53  ;;  %8196 = vst [vmem:[#allocation37_spill] sm:$0xff] %v6511_v63  ;;  %vm603_vm2 = vcmp.gt.s32.totalorder %v307_v55, 0  ;;  %v321_v51 = vand.u32 15, %v189_v52  ;;  %v6532_v46 = vld [vmem:[%s6099_s24 + $0x58] sm:$0xff]  ;;  %8197 = vst [vmem:[#allocation38_spill] sm:$0xff] %v6537_v18  ;;  %v6540_v52 = vsel %vm634_vm15, 1.0, %v8180_v59 }
  0x3e   : > { %5509 = vmatprep.mubr.msk.f32.mxu1 %vm816_vm1, %v755_v36  ;;  %v6455_v36 = vld [vmem:[%s6099_s24 + $0x50] sm:$0xff]  ;;  %8198 = vst [vmem:[#allocation39_spill] sm:$0xff] %v6540_v52  ;;  %vm636_vm3 = vcmp.lt.s32.totalorder %v314_v11, 15  ;;  %v335_v49 = vand.u32 15, %v191_v43  ;;  %v6566_v11 = vld [vmem:[%s6099_s24 + $0x68] sm:$0xff]  ;;  %vm611_vm10 = vcmp.gt.s32.totalorder %v363_v24, 0 }
  0x3f   : > { %v6480_v45 = vmul.f32 %v6375_v13, %v6455_v36  ;;  %vm605_vm4 = vcmp.gt.s32.totalorder %v321_v51, 0  ;;  %v6571_v51 = vld [vmem:[%s6099_s24 + $0x7a] sm:$0xff]  ;;  %v6673_v24 = vld [vmem:[%s6099_s24 + $0xaa] sm:$0xff]  ;;  %vm613_vm12 = vcmp.gt.s32.totalorder %v377_v17, 0 }
  0x40   : > { %5560 = vmatmul.mubr.msk.f32.gmra.mxu0 %vm816_vm1, %v1569_v60  ;;  %v6504_v60 = vsel %vm6446_vm13, 1.0, %v8180_v59  ;;  %8201 = vst [vmem:[#allocation42_spill] sm:$0xff] %v6571_v51  ;;  %vm607_vm6 = vcmp.gt.s32.totalorder %v335_v49, 0  ;;  %8218 = vst [vmem:[#allocation59_spill] sm:$0xff] %v6673_v24  ;;  %v6707_v17 = vld [vmem:[%s6099_s24 + $0xba] sm:$0xff] }
  0x41   : > { %8192 = vst [vmem:[#allocation33_spill] sm:$0xff] %v6480_v45  ;;  %5510 = vmatmul.mubr.msk.f32.gmra.mxu1 %vm816_vm1, %v6439_v1  ;;  %5562 = vmatprep.mubr.msk.f32.mxu0 %vm816_vm1, %v6452_v29  ;;  %v759_v45 = vmul.f32 %v6433_v2, %v6455_v36  ;;  %8194 = vst [vmem:[#allocation35_spill] sm:$0xff] %v6504_v60  ;;  %v6516_v29 = vsel %vm6457_vm14, 1.0, %v8180_v59  ;;  %v1573_v53 = vmul.f32 %v6504_v60, %v6499_v48 }
  0x42   : > { %5512 = vmatprep.mubr.msk.f32.mxu1 %vm816_vm1, %v757_v3  ;;  %v6508_v3 = vmul.f32 %v6419_v30, %v6488_v7  ;;  %v761_v55 = vmul.f32 %v6516_v29, %v6488_v7  ;;  %v6550_v60 = vsel %vm603_vm2, 1.0, %v8180_v59  ;;  %v192_v48 = vadd.s32 152, %v6094_v4  ;;  %8224 = vst [vmem:[#allocation65_spill] sm:$0xff] %v6707_v17 }
  0x44   : > { %8195 = vst [vmem:[#allocation36_spill] sm:$0xff] %v6508_v3  ;;  %5563 = vmatmul.mubr.msk.f32.gmra.mxu0 %vm816_vm1, %v1571_v28  ;;  %v6526_v3 = vld [vmem:[%s6099_s24 + $0x70] sm:$0xff] }
  0x45   : > { %5513 = vmatmul.mubr.msk.f32.gmra.mxu1 %vm816_vm1, %v6494_v0  ;;  %5565 = vmatprep.mubr.msk.f32.mxu0 %vm816_vm1, %v6511_v63  ;;  %v6544_v28 = vmul.f32 %v6433_v2, %v6526_v3  ;;  %v328_v63 = vand.u32 15, %v190_v5  ;;  %v763_v43 = vmul.f32 %v6550_v60, %v6526_v3  ;;  %v6574_v5 = vsel %vm636_vm3, 1.0, %v8180_v59 }
  0x46   : > { %5515 = vmatprep.mubr.msk.f32.mxu1 %vm816_vm1, %v759_v45  ;;  %v6547_v45 = vld [vmem:[%s6099_s24 + $0x62] sm:$0xff]  ;;  %8202 = vst [vmem:[#allocation43_spill] sm:$0xff] %v6574_v5 }
  0x47   : > { %8199 = vst [vmem:[#allocation40_spill] sm:$0xff] %v6544_v28  ;;  %8200 = vst [vmem:[#allocation41_spill] sm:$0xff] %v6547_v45  ;;  %v1575_v28 = vmul.f32 %v6540_v52, %v6537_v18  ;;  %v6584_v52 = vsel %vm605_vm4, 1.0, %v8180_v59  ;;  %vm638_vm5 = vcmp.lt.s32.totalorder %v328_v63, 15  ;;  %v194_v18 = vadd.s32 168, %v6094_v4  ;;  %v6605_v63 = vld [vmem:[%s6099_s24 + $0x8a] sm:$0xff] }
  0x48   : > { %5566 = vmatmul.mubr.msk.f32.gmra.mxu0 %vm816_vm1, %v1573_v53  ;;  %v6578_v53 = vmul.f32 %v6516_v29, %v6560_v38  ;;  %v765_v40 = vmul.f32 %v6584_v52, %v6560_v38  ;;  %8205 = vst [vmem:[#allocation46_spill] sm:$0xff] %v6605_v63  ;;  %v6608_v49 = vsel %vm638_vm5, 1.0, %v8180_v59 }
  0x49   : > { %5516 = vmatmul.mubr.msk.f32.gmra.mxu1 %vm816_vm1, %v6532_v46  ;;  %5568 = vmatprep.mubr.msk.f32.mxu0 %vm816_vm1, %v6547_v45  ;;  %v342_v45 = vand.u32 15, %v192_v48  ;;  %v6600_v48 = vld [vmem:[%s6099_s24 + $0x78] sm:$0xff]  ;;  %8206 = vst [vmem:[#allocation47_spill] sm:$0xff] %v6608_v49 }
  0x4a   : > { %5518 = vmatprep.mubr.msk.f32.mxu1 %vm816_vm1, %v761_v55  ;;  %8203 = vst [vmem:[#allocation44_spill] sm:$0xff] %v6578_v53  ;;  %v6581_v55 = vld [vmem:[%s6099_s24 + $0x72] sm:$0xff]  ;;  %v1577_v53 = vmul.f32 %v6574_v5, %v6571_v51  ;;  %v6618_v5 = vsel %vm607_vm6, 1.0, %v8180_v59  ;;  %v196_v51 = vadd.s32 184, %v6094_v4 }
  0x4b   : > { %8204 = vst [vmem:[#allocation45_spill] sm:$0xff] %v6581_v55  ;;  %8209 = vst [vmem:[#allocation50_spill] sm:$0xff] %v6618_v5  ;;  %vm640_vm7 = vcmp.lt.s32.totalorder %v342_v45, 15  ;;  %v767_v32 = vmul.f32 %v6618_v5, %v6594_v26 }
  0x4c   : > { %5569 = vmatmul.mubr.msk.f32.gmra.mxu0 %vm816_vm1, %v1575_v28  ;;  %v6612_v28 = vmul.f32 %v6550_v60, %v6594_v26  ;;  %v6642_v45 = vsel %vm640_vm7, 1.0, %v8180_v59 }
  0x4d   : > { %5519 = vmatmul.mubr.msk.f32.gmra.mxu1 %vm816_vm1, %v6566_v11  ;;  %5571 = vmatprep.mubr.msk.f32.mxu0 %vm816_vm1, %v6581_v55  ;;  %v356_v55 = vand.u32 15, %v194_v18  ;;  %v6634_v18 = vld [vmem:[%s6099_s24 + $0x88] sm:$0xff]  ;;  %8212 = vst [vmem:[#allocation53_spill] sm:$0xff] %v6642_v45 }
  0x4e   : > { %5521 = vmatprep.mubr.msk.f32.mxu1 %vm816_vm1, %v763_v43  ;;  %8207 = vst [vmem:[#allocation48_spill] sm:$0xff] %v6612_v28  ;;  %v6615_v43 = vld [vmem:[%s6099_s24 + $0x82] sm:$0xff]  ;;  %v1579_v28 = vmul.f32 %v6608_v49, %v6605_v63  ;;  %v6652_v49 = vsel %vm609_vm8, 1.0, %v8180_v59  ;;  %v198_v63 = vadd.s32 200, %v6094_v4 }
  0x4f   : > { %8208 = vst [vmem:[#allocation49_spill] sm:$0xff] %v6615_v43  ;;  %8215 = vst [vmem:[#allocation56_spill] sm:$0xff] %v6652_v49  ;;  %vm642_vm9 = vcmp.lt.s32.totalorder %v356_v55, 15  ;;  %v769_v22 = vmul.f32 %v6652_v49, %v6628_v20 }
  0x50   : > { %5572 = vmatmul.mubr.msk.f32.gmra.mxu0 %vm816_vm1, %v1577_v53  ;;  %v6646_v53 = vmul.f32 %v6584_v52, %v6628_v20  ;;  %v6676_v55 = vsel %vm642_vm9, 1.0, %v8180_v59  ;;  %v391_v20 = vand.u32 15, %v199_v15 }
  0x51   : > { %5522 = vmatmul.mubr.msk.f32.gmra.mxu1 %vm816_vm1, %v6600_v48  ;;  %5574 = vmatprep.mubr.msk.f32.mxu0 %vm816_vm1, %v6615_v43  ;;  %v370_v43 = vand.u32 15, %v196_v51  ;;  %v6668_v51 = vld [vmem:[%s6099_s24 + $0x98] sm:$0xff]  ;;  %8219 = vst [vmem:[#allocation60_spill] sm:$0xff] %v6676_v55 }
  0x52   : > { %5524 = vmatprep.mubr.msk.f32.mxu1 %vm816_vm1, %v765_v40  ;;  %8213 = vst [vmem:[#allocation54_spill] sm:$0xff] %v6646_v53  ;;  %v6649_v40 = vld [vmem:[%s6099_s24 + $0x92] sm:$0xff]  ;;  %v1581_v53 = vmul.f32 %v6642_v45, %v6639_v34  ;;  %8217 = vst [vmem:[#allocation58_spill] sm:$0xff] %v6668_v51  ;;  %v6686_v45 = vsel %vm611_vm10, 1.0, %v8180_v59  ;;  %v200_v34 = vadd.s32 216, %v6094_v4  ;;  %vm615_vm14 = vcmp.gt.s32.totalorder %v391_v20, 0 }
  0x53   : > { %8214 = vst [vmem:[#allocation55_spill] sm:$0xff] %v6649_v40  ;;  %8222 = vst [vmem:[#allocation63_spill] sm:$0xff] %v6686_v45  ;;  %vm644_vm11 = vcmp.lt.s32.totalorder %v370_v43, 15  ;;  %v771_v15 = vmul.f32 %v6686_v45, %v6662_v10  ;;  %v6736_v20 = vld [vmem:[%s6099_s24 + $0xb8] sm:$0xff] }
  0x54   : > { %5575 = vmatmul.mubr.msk.f32.gmra.mxu0 %vm816_vm1, %v1579_v28  ;;  %v6680_v28 = vmul.f32 %v6618_v5, %v6662_v10  ;;  %v6696_v5 = vld [vmem:[%s6099_s24 + $0xc0] sm:$0xff]  ;;  %v6710_v43 = vsel %vm644_vm11, 1.0, %v8180_v59  ;;  %v405_v10 = vand.u32 15, %v201_v8 }
  0x55   : > { %5525 = vmatmul.mubr.msk.f32.gmra.mxu1 %vm816_vm1, %v6634_v18  ;;  %5577 = vmatprep.mubr.msk.f32.mxu0 %vm816_vm1, %v6649_v40  ;;  %v384_v40 = vand.u32 15, %v198_v63  ;;  %8223 = vst [vmem:[#allocation64_spill] sm:$0xff] %v6696_v5  ;;  %v6702_v63 = vld [vmem:[%s6099_s24 + $0xa8] sm:$0xff]  ;;  %8225 = vst [vmem:[#allocation66_spill] sm:$0xff] %v6710_v43 }
  0x56   : > { %5527 = vmatprep.mubr.msk.f32.mxu1 %vm816_vm1, %v767_v32  ;;  %8220 = vst [vmem:[#allocation61_spill] sm:$0xff] %v6680_v28  ;;  %v6683_v32 = vld [vmem:[%s6099_s24 + $0xa2] sm:$0xff]  ;;  %v1583_v28 = vmul.f32 %v6676_v55, %v6673_v24  ;;  %v6720_v55 = vsel %vm613_vm12, 1.0, %v8180_v59  ;;  %v202_v24 = vadd.s32 232, %v6094_v4  ;;  %vm617_vm2 = vcmp.gt.s32.totalorder %v405_v10, 0  ;;  %v6774_v10 = vld [vmem:[%s6099_s24 + $0xda] sm:$0xff] }
  0x57   : > { %8221 = vst [vmem:[#allocation62_spill] sm:$0xff] %v6683_v32  ;;  %vm646_vm13 = vcmp.lt.s32.totalorder %v384_v40, 15  ;;  %v773_v8 = vmul.f32 %v6720_v55, %v6696_v5  ;;  %8232 = vst [vmem:[#allocation73_spill] sm:$0xff] %v6774_v10 }
  0x58   : > { %5578 = vmatmul.mubr.msk.f32.gmra.mxu0 %vm816_vm1, %v1581_v53  ;;  %v6714_v53 = vmul.f32 %v6652_v49, %v6696_v5  ;;  %v6730_v49 = vld [vmem:[%s6099_s24 + $0xd0] sm:$0xff]  ;;  %v6744_v40 = vsel %vm646_vm13, 1.0, %v8180_v59 }
  0x59   : > { %5528 = vmatmul.mubr.msk.f32.gmra.mxu1 %vm816_vm1, %v6668_v51  ;;  %5580 = vmatprep.mubr.msk.f32.mxu0 %vm816_vm1, %v6683_v32  ;;  %v398_v32 = vand.u32 15, %v200_v34  ;;  %v203_v51 = vadd.s32 240, %v6094_v4  ;;  %v6741_v34 = vld [vmem:[%s6099_s24 + $0xca] sm:$0xff]  ;;  %8229 = vst [vmem:[#allocation70_spill] sm:$0xff] %v6744_v40 }
  0x5a   : > { %5530 = vmatprep.mubr.msk.f32.mxu1 %vm816_vm1, %v769_v22  ;;  %8226 = vst [vmem:[#allocation67_spill] sm:$0xff] %v6714_v53  ;;  %v6717_v22 = vld [vmem:[%s6099_s24 + $0xb2] sm:$0xff]  ;;  %v1585_v53 = vmul.f32 %v6710_v43, %v6707_v17  ;;  %8228 = vst [vmem:[#allocation69_spill] sm:$0xff] %v6741_v34  ;;  %v6754_v43 = vsel %vm615_vm14, 1.0, %v8180_v59  ;;  %v204_v17 = vadd.s32 248, %v6094_v4 }
  0x5b   : > { %8227 = vst [vmem:[#allocation68_spill] sm:$0xff] %v6717_v22  ;;  %vm648_vm15 = vcmp.lt.s32.totalorder %v398_v32, 15  ;;  %v419_v5 = vand.u32 15, %v203_v51  ;;  %v775_v4 = vmul.f32 %v6754_v43, %v6730_v49 }
  0x5c   : > { %5581 = vmatmul.mubr.msk.f32.gmra.mxu0 %vm816_vm1, %v1583_v28  ;;  %v6748_v28 = vmul.f32 %v6686_v45, %v6730_v49  ;;  %v6763_v45 = vld [vmem:[%s6099_s24 + $0xe0] sm:$0xff]  ;;  %v6777_v51 = vsel %vm648_vm15, 1.0, %v8180_v59 }
  0x5d   : > { %5531 = vmatmul.mubr.msk.f32.gmra.mxu1 %vm816_vm1, %v6702_v63  ;;  %5583 = vmatprep.mubr.msk.f32.mxu0 %vm816_vm1, %v6717_v22  ;;  %v412_v22 = vand.u32 15, %v202_v24  ;;  %v6769_v24 = vld [vmem:[%s6099_s24 + $0xc8] sm:$0xff]  ;;  %8233 = vst [vmem:[#allocation74_spill] sm:$0xff] %v6777_v51  ;;  %v6781_v32 = vmul.f32 %v6720_v55, %v6763_v45  ;;  %vm619_vm4 = vcmp.gt.s32.totalorder %v419_v5, 0 }
  0x5e   : > { %5533 = vmatprep.mubr.msk.f32.mxu1 %vm816_vm1, %v771_v15  ;;  %8230 = vst [vmem:[#allocation71_spill] sm:$0xff] %v6748_v28  ;;  %v6751_v15 = vld [vmem:[%s6099_s24 + $0xc2] sm:$0xff]  ;;  %v1587_v28 = vmul.f32 %v6744_v40, %v6741_v34  ;;  %v426_v40 = vand.u32 15, %v204_v17  ;;  %v6795_v34 = vld [vmem:[%s6099_s24 + $0xf0] sm:$0xff] }
  0x5f   : > { %8231 = vst [vmem:[#allocation72_spill] sm:$0xff] %v6751_v15  ;;  %8234 = vst [vmem:[#allocation75_spill] sm:$0xff] %v6781_v32  ;;  %vm650_vm3 = vcmp.lt.s32.totalorder %v412_v22, 15  ;;  %v6801_v22 = vld [vmem:[%s6099_s24 + $0xd8] sm:$0xff]  ;;  %v6806_v17 = vld [vmem:[%s6099_s24 + $0xea] sm:$0xff]  ;;  %v6819_v32 = vsel %vm619_vm4, 1.0, %v8180_v59 }
  0x60   : > { %5584 = vmatmul.mubr.msk.f32.gmra.mxu0 %vm816_vm1, %v1585_v53  ;;  %v6784_v53 = vld [vmem:[%s6099_s24 + $0xd2] sm:$0xff]  ;;  %8237 = vst [vmem:[#allocation78_spill] sm:$0xff] %v6801_v22  ;;  %vm652_vm5 = vcmp.lt.s32.totalorder %v426_v40, 15  ;;  %v6835_v40 = vld [vmem:[%s6099_s24 + $0xfa] sm:$0xff] }
  0x61   : > { %5534 = vmatmul.mubr.msk.f32.gmra.mxu1 %vm816_vm1, %v6736_v20  ;;  %5586 = vmatprep.mubr.msk.f32.mxu0 %vm816_vm1, %v6751_v15  ;;  %8235 = vst [vmem:[#allocation76_spill] sm:$0xff] %v6784_v53  ;;  %v1589_v15 = vmul.f32 %v6777_v51, %v6774_v10  ;;  %v6813_v51 = vmul.f32 %v6754_v43, %v6795_v34 }
  0x62   : > { %5536 = vmatprep.mubr.msk.f32.mxu1 %vm816_vm1, %v773_v8  ;;  %v6787_v8 = vsel %vm617_vm2, 1.0, %v8180_v59  ;;  %v779_v10 = vmul.f32 %v6819_v32, %v6795_v34 }
  0x63   : > { %8236 = vst [vmem:[#allocation77_spill] sm:$0xff] %v6787_v8  ;;  %v777_v5 = vmul.f32 %v6787_v8, %v6763_v45  ;;  %8238 = vst [vmem:[#allocation79_spill] sm:$0xff] %v6813_v51  ;;  %v6830_v51 = vld [vmem:[%s6099_s24 + $0xe8] sm:$0xff]  ;;  %v6838_v8 = vsel %vm652_vm5, 1.0, %v8180_v59 }
  0x64   : > { %5587 = vmatmul.mubr.msk.f32.gmra.mxu0 %vm816_vm1, %v1587_v28  ;;  %v6809_v28 = vsel %vm650_vm3, 1.0, %v8180_v59  ;;  %v1984_v59 = vmul.f32 %v6271_v50, %v6293_v61  ;;  %v6871_v50 = vld [vmem:[%s8065_s1 + $0x1c] sm:$0xf]  ;;  %v6876_v61 = vld [vmem:[%s8065_s1 + $0x20] sm:$0xf] }
  0x65   : > { %5537 = vmatmul.mubr.msk.f32.gmra.mxu1 %vm816_vm1, %v6769_v24  ;;  %5589 = vmatprep.mubr.msk.f32.mxu0 %vm816_vm1, %v6784_v53  ;;  %v1591_v53 = vmul.f32 %v6809_v28, %v6806_v17 }
  0x66   : > { %5539 = vmatprep.mubr.msk.f32.mxu1 %vm816_vm1, %v775_v4  ;;  %v6816_v4 = vld [vmem:[%s6099_s24 + $0xe2] sm:$0xff] }
  0x68   : > { %5590 = vmatmul.mubr.msk.f32.gmra.mxu0 %vm816_vm1, %v1589_v15  ;;  %v1593_v15 = vmul.f32 %v6838_v8, %v6835_v40 }
  0x69   : > { %5540 = vmatmul.mubr.msk.f32.gmra.mxu1 %vm816_vm1, %v6801_v22  ;;  %5592 = vmatprep.mubr.msk.f32.mxu0 %vm816_vm1, %v6816_v4  ;;  %v6841_v22 = vld [vmem:[%s6099_s24 + $0xf2] sm:$0xff] }
  0x6a   : > { %5542 = vmatprep.mubr.msk.f32.mxu1 %vm816_vm1, %v777_v5  ;;  %v6852_v5 = vld [vmem:[%s6099_s24 + $0xf8] sm:$0xff] }
  0x6c   : > { %5593 = vmatmul.mubr.msk.f32.gmra.mxu0 %vm816_vm1, %v1591_v53  ;;  %v7012_v53 = vld [vmem:[%s6099_s24 + $0x101] sm:$0xff] }
  0x6d   : > { %5543 = vmatmul.mubr.msk.f32.gmra.mxu1 %vm816_vm1, %v6830_v51  ;;  %5595 = vmatprep.mubr.msk.f32.mxu0 %vm816_vm1, %v6841_v22 }
  0x6e   : > { %5545 = vmatprep.mubr.msk.f32.mxu1 %vm816_vm1, %v779_v10  ;;  %v1986_v10 = vmul.f32 %v6296_v62, %v6322_v41  ;;  %v8250_v62 = vld [vmem:[#allocation64_spill] sm:$0xff]  ;;  %v8251_v41 = vld [vmem:[#allocation63_spill] sm:$0xff] }
  0x70   : > { %5596 = vmatmul.mubr.msk.f32.gmra.mxu0 %vm816_vm1, %v1593_v15  ;;  %v7022_v15 = vld [vmem:[%s6099_s24 + $0x108] sm:$0xff] }
  0x71   : > { %5546 = vmatmul.mubr.msk.f32.gmra.mxu1 %vm816_vm1, %v6852_v5  ;;  %5650 = vmatprep.mubr.msk.f32.mxu0 %vm816_vm1, %v6113_v9  ;;  %v1988_v9 = vmul.f32 %v6327_v42, %v6370_v12  ;;  %v2006_v42 = vmul.f32 %v8251_v41, %v8250_v62  ;;  %v8254_v12 = vld [vmem:[#allocation12_spill] sm:$0xff]  ;;  %v8284_v41 = vld [vmem:[#allocation41_spill] sm:$0xff] }
  0x72   : > { %5600 = vmatprep.mubr.msk.f32.mxu1 %vm816_vm1, %v1984_v59  ;;  %v7025_v59 = vld [vmem:[%s6099_s24 + $0x109] sm:$0xff] }
  0x74   : > { %5651 = vmatmul.mubr.msk.f32.vlgmr.msra.gmra.mxu0 %vm816_vm1, %v6135_v14  ;;  %v1990_v14 = vmul.f32 %v6375_v13, %v6414_v27  ;;  %v8239_v27 = vld [vmem:[#allocation2_spill] sm:$0xff]  ;;  %v8255_v13 = vld [vmem:[#allocation13_spill] sm:$0xff] }
  0x75   : > { %5601 = vmatmul.mubr.msk.f32.vlgmr.msra.gmra.mxu1 %vm816_vm1, %v6358_v58  ;;  %5749 = vmatpush3.msk.msra.mxu0 %vm913_vm0, %v6351_v57  ;;  %v8253_v57 = vld [vmem:[#allocation9_spill] sm:$0xff]  ;;  %v2008_v58 = vmul.f32 %v6720_v55, %v6730_v49  ;;  %v7000_v49 = vld [vmem:[%s6099_s24 + $0x100] sm:$0xff] }
  0x76   : > { %5699 = vmatpush3.msk.msra.mxu1 %vm913_vm0, %v6346_v56  ;;  %5603 = vmatprep.mubr.msk.f32.mxu1 %vm816_vm1, %v1986_v10  ;;  %v8252_v56 = vld [vmem:[#allocation8_spill] sm:$0xff]  ;;  %v8261_v55 = vld [vmem:[#allocation17_spill] sm:$0xff] }
  0x77   : > { %5653 = vmatprep.mubr.msk.f32.mxu0 %vm816_vm1, %v6145_v16  ;;  %5798 = vmatprep.subr.msk.mxu1 %vm913_vm0, %v6871_v50  ;;  %v1992_v16 = vmul.f32 %v6419_v30, %v6455_v36  ;;  %v8241_v30 = vld [vmem:[#allocation51_spill] sm:$0xff]  ;;  %v8256_v36 = vld [vmem:[#allocation78_spill] sm:$0xff]  ;;  %v8263_v10 = vld [vmem:[#allocation20_spill] sm:$0xff] }
  0x78   : > { %5848 = vmatprep.subr.msk.mxu0 %vm913_vm0, %v6876_v61  ;;  %5654 = vmatmul.mubr.msk.f32.gmra.mxu0 %vm816_vm1, %v6163_v19  ;;  %v1994_v19 = vmul.f32 %v6433_v2, %v6488_v7  ;;  %v2010_v2 = vmul.f32 %v6754_v43, %v6763_v45  ;;  %v8257_v7 = vld [vmem:[#allocation14_spill] sm:$0xff]  ;;  %v8260_v45 = vld [vmem:[#allocation16_spill] sm:$0xff]  ;;  %v2014_v43 = vmul.f32 %v6819_v32, %v7000_v49 }
  0x79   : > { %5604 = vmatmul.mubr.msk.f32.gmra.mxu1 %vm816_vm1, %v6402_v35  ;;  %5656 = vmatprep.mubr.msk.f32.mxu0 %vm816_vm1, %v6169_v21  ;;  %v1996_v21 = vmul.f32 %v6516_v29, %v6526_v3  ;;  %v8240_v29 = vld [vmem:[#allocation3_spill] sm:$0xff]  ;;  %v8259_v3 = vld [vmem:[#allocation77_spill] sm:$0xff] }
  0x7a   : > { %5606 = vmatprep.mubr.msk.f32.mxu1 %vm816_vm1, %v1988_v9  ;;  %v8264_v9 = vld [vmem:[#allocation29_spill] sm:$0xff] }
  0x7c   : > { %5657 = vmatmul.mubr.msk.f32.gmra.mxu0 %vm816_vm1, %v6183_v23  ;;  %v1998_v23 = vmul.f32 %v6550_v60, %v6560_v38  ;;  %v8246_v38 = vld [vmem:[#allocation57_spill] sm:$0xff]  ;;  %v8258_v60 = vld [vmem:[#allocation15_spill] sm:$0xff] }
  0x7d   : > { %5607 = vmatmul.mubr.msk.f32.gmra.mxu1 %vm816_vm1, %v6439_v1  ;;  %5659 = vmatprep.mubr.msk.f32.mxu0 %vm816_vm1, %v6189_v25  ;;  %v2000_v25 = vmul.f32 %v6584_v52, %v6594_v26  ;;  %v8245_v26 = vld [vmem:[#allocation5_spill] sm:$0xff]  ;;  %v2012_v52 = vmul.f32 %v8259_v3, %v6795_v34  ;;  %v8262_v34 = vld [vmem:[#allocation18_spill] sm:$0xff] }
  0x7e   : > { %5609 = vmatprep.mubr.msk.f32.mxu1 %vm816_vm1, %v1990_v14  ;;  %v8265_v14 = vld [vmem:[#allocation30_spill] sm:$0xff] }
  0x80   : > { %5660 = vmatmul.mubr.msk.f32.gmra.mxu0 %vm816_vm1, %v6213_v31  ;;  %v8242_v31 = vld [vmem:[#allocation50_spill] sm:$0xff] }
  0x81   : > { %5610 = vmatmul.mubr.msk.f32.gmra.mxu1 %vm816_vm1, %v6494_v0  ;;  %5662 = vmatprep.mubr.msk.f32.mxu0 %vm816_vm1, %v6219_v33  ;;  %v2002_v33 = vmul.f32 %v8242_v31, %v8241_v30  ;;  %v8272_v30 = vld [vmem:[#allocation25_spill] sm:$0xff]  ;;  %v8275_v31 = vld [vmem:[#allocation23_spill] sm:$0xff] }
  0x82   : > { %5612 = vmatprep.mubr.msk.f32.mxu1 %vm816_vm1, %v1992_v16  ;;  %v8266_v16 = vld [vmem:[#allocation10_spill] sm:$0xff] }
  0x84   : > { %5663 = vmatmul.mubr.msk.f32.gmra.mxu0 %vm816_vm1, %v6235_v37  ;;  %v8243_v37 = vld [vmem:[#allocation58_spill] sm:$0xff] }
  0x85   : > { %5613 = vmatmul.mubr.msk.f32.gmra.mxu1 %vm816_vm1, %v6532_v46  ;;  %5665 = vmatprep.mubr.msk.f32.mxu0 %vm816_vm1, %v6241_v39  ;;  %v8247_v39 = vld [vmem:[#allocation56_spill] sm:$0xff] }
  0x86   : > { %5615 = vmatprep.mubr.msk.f32.mxu1 %vm816_vm1, %v1994_v19  ;;  %v8267_v19 = vld [vmem:[#allocation19_spill] sm:$0xff] }
  0x88   : > { %5666 = vmatmul.mubr.msk.f32.gmra.mxu0 %vm816_vm1, %v6257_v44  ;;  %v2004_v44 = vmul.f32 %v8247_v39, %v8246_v38  ;;  %v8279_v38 = vld [vmem:[#allocation26_spill] sm:$0xff] }
  0x89   : > { %5616 = vmatmul.mubr.msk.f32.gmra.mxu1 %vm816_vm1, %v6566_v11  ;;  %5668 = vmatprep.mubr.msk.f32.mxu0 %vm816_vm1, %v6264_v47  ;;  %v8248_v47 = vld [vmem:[#allocation6_spill] sm:$0xff] }
  0x8a   : > { %5618 = vmatprep.mubr.msk.f32.mxu1 %vm816_vm1, %v1996_v21  ;;  %v2799_v21 = vmul.f32 %v8267_v19, %v8266_v16  ;;  %v8301_v16 = vld [vmem:[#allocation61_spill] sm:$0xff] }
  0x8c   : > { %5669 = vmatmul.mubr.msk.f32.gmra.mxu0 %vm816_vm1, %v6283_v54  ;;  %v8249_v54 = vld [vmem:[#allocation7_spill] sm:$0xff] }
  0x8d   : > { %5619 = vmatmul.mubr.msk.f32.gmra.mxu1 %vm816_vm1, %v6600_v48  ;;  %5671 = vmatprep.mubr.msk.f32.mxu0 %vm816_vm1, %v6103_v6  ;;  %v8244_v6 = vld [vmem:[#allocation4_spill] sm:$0xff] }
  0x8e   : > { %5621 = vmatprep.mubr.msk.f32.mxu1 %vm816_vm1, %v1998_v23  ;;  %v8268_v23 = vld [vmem:[#allocation22_spill] sm:$0xff] }
  0x90   : > { %5672 = vmatmul.mubr.msk.f32.gmra.mxu0 %vm816_vm1, %v8239_v27  ;;  %v8271_v27 = vld [vmem:[#allocation21_spill] sm:$0xff] }
  0x91   : > { %5622 = vmatmul.mubr.msk.f32.gmra.mxu1 %vm816_vm1, %v6634_v18  ;;  %5674 = vmatprep.mubr.msk.f32.mxu0 %vm816_vm1, %v8240_v29 }
  0x92   : > { %5624 = vmatprep.mubr.msk.f32.mxu1 %vm816_vm1, %v2000_v25  ;;  %v8269_v25 = vld [vmem:[#allocation31_spill] sm:$0xff] }
  0x94   : > { %5675 = vmatmul.mubr.msk.f32.gmra.mxu0 %vm816_vm1, %v8244_v6  ;;  %v8276_v6 = vld [vmem:[#allocation28_spill] sm:$0xff] }
  0x95   : > { %5625 = vmatmul.mubr.msk.f32.gmra.mxu1 %vm816_vm1, %v8243_v37  ;;  %5677 = vmatprep.mubr.msk.f32.mxu0 %vm816_vm1, %v8245_v26  ;;  %v8278_v26 = vld [vmem:[#allocation34_spill] sm:$0xff] }
  0x96   : > { %5627 = vmatprep.mubr.msk.f32.mxu1 %vm816_vm1, %v2002_v33  ;;  %v2805_v39 = vmul.f32 %v8279_v38, %v8278_v26 }
  0x98   : > { %5678 = vmatmul.mubr.msk.f32.gmra.mxu0 %vm816_vm1, %v8248_v47  ;;  %v8282_v47 = vld [vmem:[#allocation38_spill] sm:$0xff] }
  0x99   : > { %5628 = vmatmul.mubr.msk.f32.gmra.mxu1 %vm816_vm1, %v6702_v63  ;;  %5680 = vmatprep.mubr.msk.f32.mxu0 %vm816_vm1, %v8249_v54  ;;  %v8283_v54 = vld [vmem:[#allocation35_spill] sm:$0xff] }
  0x9a   : > { %5630 = vmatprep.mubr.msk.f32.mxu1 %vm816_vm1, %v2004_v44  ;;  %v8280_v44 = vld [vmem:[#allocation37_spill] sm:$0xff]  ;;  %v2807_v62 = vmul.f32 %v8283_v54, %v8282_v47  ;;  %v8309_v47 = vld [vmem:[#allocation71_spill] sm:$0xff] }
  0x9c   : > { %5681 = vmatmul.mubr.msk.f32.gmra.mxu0 %vm816_vm1, %v8252_v56  ;;  %v8287_v56 = vld [vmem:[#allocation39_spill] sm:$0xff] }
  0x9d   : > { %5631 = vmatmul.mubr.msk.f32.gmra.mxu1 %vm816_vm1, %v6736_v20  ;;  %5683 = vmatprep.mubr.msk.f32.mxu0 %vm816_vm1, %v8253_v57 }
  0x9e   : > { %5633 = vmatprep.mubr.msk.f32.mxu1 %vm816_vm1, %v2006_v42  ;;  %v8286_v42 = vld [vmem:[#allocation42_spill] sm:$0xff] }
  0x9f   : > { %v2809_v57 = vmul.f32 %v8287_v56, %v8286_v42 }
  0xa0   : > { %5684 = vmatmul.mubr.msk.f32.gmra.mxu0 %vm816_vm1, %v8254_v12  ;;  %v8290_v12 = vld [vmem:[#allocation46_spill] sm:$0xff] }
  0xa1   : > { %5634 = vmatmul.mubr.msk.f32.gmra.mxu1 %vm816_vm1, %v6769_v24  ;;  %5686 = vmatprep.mubr.msk.f32.mxu0 %vm816_vm1, %v8255_v13  ;;  %v8291_v13 = vld [vmem:[#allocation43_spill] sm:$0xff] }
  0xa2   : > { %5636 = vmatprep.mubr.msk.f32.mxu1 %vm816_vm1, %v2008_v58  ;;  %v8288_v58 = vld [vmem:[#allocation45_spill] sm:$0xff] }
  0xa4   : > { %5687 = vmatmul.mubr.msk.f32.gmra.mxu0 %vm816_vm1, %v8257_v7  ;;  %v8292_v7 = vld [vmem:[#allocation49_spill] sm:$0xff] }
  0xa5   : > { %5637 = vmatmul.mubr.msk.f32.gmra.mxu1 %vm816_vm1, %v8256_v36  ;;  %5689 = vmatprep.mubr.msk.f32.mxu0 %vm816_vm1, %v8258_v60  ;;  %v8294_v60 = vld [vmem:[#allocation52_spill] sm:$0xff] }
  0xa6   : > { %5639 = vmatprep.mubr.msk.f32.mxu1 %vm816_vm1, %v2010_v2  ;;  %v2811_v2 = vmul.f32 %v8291_v13, %v8290_v12  ;;  %v8313_v12 = vld [vmem:[#allocation75_spill] sm:$0xff] }
  0xa8   : > { %5690 = vmatmul.mubr.msk.f32.gmra.mxu0 %vm816_vm1, %v8260_v45 }
  0xa9   : > { %5640 = vmatmul.mubr.msk.f32.gmra.mxu1 %vm816_vm1, %v6830_v51  ;;  %5692 = vmatprep.mubr.msk.f32.mxu0 %vm816_vm1, %v8261_v55  ;;  %v8296_v55 = vld [vmem:[#allocation55_spill] sm:$0xff] }
  0xaa   : > { %5642 = vmatprep.mubr.msk.f32.mxu1 %vm816_vm1, %v2012_v52  ;;  %v8295_v52 = vld [vmem:[#allocation47_spill] sm:$0xff] }
  0xab   : > { %v2813_v45 = vmul.f32 %v8295_v52, %v8294_v60 }
  0xac   : > { %5693 = vmatmul.mubr.msk.f32.gmra.mxu0 %vm816_vm1, %v8262_v34 }
  0xad   : > { %5643 = vmatmul.mubr.msk.f32.gmra.mxu1 %vm816_vm1, %v6852_v5  ;;  %5695 = vmatprep.mubr.msk.f32.mxu0 %vm816_vm1, %v7012_v53 }
  0xae   : > { %5645 = vmatprep.mubr.msk.f32.mxu1 %vm816_vm1, %v2014_v43 }
  0xb0   : > { %5696 = vmatmul.mubr.msk.f32.gmra.mxu0 %vm816_vm1, %v7025_v59 }
  0xb1   : > { %5646 = vmatmul.mubr.msk.f32.gmra.mxu1 %vm816_vm1, %v7022_v15  ;;  %5750 = vmatprep.mubr.msk.f32.mxu0 %vm816_vm1, %v8264_v9 }
  0xb2   : > { %5700 = vmatprep.mubr.msk.f32.mxu1 %vm816_vm1, %v8263_v10  ;;  %v8298_v10 = vld [vmem:[#allocation59_spill] sm:$0xff] }
  0xb4   : > { %5751 = vmatmul.mubr.msk.f32.vlgmr.msra.gmra.mxu0 %vm816_vm1, %v6402_v35  ;;  %v8270_v35 = vld [vmem:[#allocation24_spill] sm:$0xff] }
  0xb5   : > { %5701 = vmatmul.mubr.msk.f32.vlgmr.msra.gmra.mxu1 %vm816_vm1, %v8265_v14  ;;  %5849 = vmatpush3.msk.msra.mxu0 %vm913_vm0, %v6876_v61  ;;  %v2801_v29 = vmul.f32 %v8271_v27, %v8270_v35  ;;  %v8274_v61 = vld [vmem:[#allocation27_spill] sm:$0xff]  ;;  %v8300_v14 = vld [vmem:[#allocation62_spill] sm:$0xff] }
  0xb6   : > { %5799 = vmatpush3.msk.msra.mxu1 %vm913_vm0, %v6871_v50  ;;  %5703 = vmatprep.mubr.msk.f32.mxu1 %vm816_vm1, %v8268_v23  ;;  %v8273_v50 = vld [vmem:[#allocation32_spill] sm:$0xff]  ;;  %v2803_v33 = vmul.f32 %v8275_v31, %v8274_v61  ;;  %v8305_v61 = vld [vmem:[#allocation67_spill] sm:$0xff] }
  0xb7   : > { %5753 = vmatprep.mubr.msk.f32.mxu0 %vm816_vm1, %v8269_v25 }
  0xb8   : > { %5754 = vmatmul.mubr.msk.f32.gmra.mxu0 %vm816_vm1, %v6439_v1  ;;  %v8277_v1 = vld [vmem:[#allocation33_spill] sm:$0xff] }
  0xb9   : > { %5704 = vmatmul.mubr.msk.f32.gmra.mxu1 %vm816_vm1, %v2799_v21  ;;  %5756 = vmatprep.mubr.msk.f32.mxu0 %vm816_vm1, %v8273_v50  ;;  %v8304_v50 = vld [vmem:[#allocation68_spill] sm:$0xff] }
  0xba   : > { %5706 = vmatprep.mubr.msk.f32.mxu1 %vm816_vm1, %v8272_v30 }
  0xbc   : > { %5757 = vmatmul.mubr.msk.f32.gmra.mxu0 %vm816_vm1, %v6494_v0  ;;  %v8281_v0 = vld [vmem:[#allocation36_spill] sm:$0xff] }
  0xbd   : > { %5707 = vmatmul.mubr.msk.f32.gmra.mxu1 %vm816_vm1, %v2801_v29  ;;  %5759 = vmatprep.mubr.msk.f32.mxu0 %vm816_vm1, %v8277_v1  ;;  %v8303_v29 = vld [vmem:[#allocation60_spill] sm:$0xff] }
  0xbe   : > { %5709 = vmatprep.mubr.msk.f32.mxu1 %vm816_vm1, %v8276_v6 }
  0xc0   : > { %5760 = vmatmul.mubr.msk.f32.gmra.mxu0 %vm816_vm1, %v6532_v46  ;;  %v8285_v46 = vld [vmem:[#allocation40_spill] sm:$0xff] }
  0xc1   : > { %5710 = vmatmul.mubr.msk.f32.gmra.mxu1 %vm816_vm1, %v2803_v33  ;;  %5762 = vmatprep.mubr.msk.f32.mxu0 %vm816_vm1, %v8281_v0  ;;  %v8308_v0 = vld [vmem:[#allocation72_spill] sm:$0xff] }
  0xc2   : > { %5712 = vmatprep.mubr.msk.f32.mxu1 %vm816_vm1, %v8280_v44 }
  0xc4   : > { %5763 = vmatmul.mubr.msk.f32.gmra.mxu0 %vm816_vm1, %v6566_v11  ;;  %v8289_v11 = vld [vmem:[#allocation44_spill] sm:$0xff] }
  0xc5   : > { %5713 = vmatmul.mubr.msk.f32.gmra.mxu1 %vm816_vm1, %v2805_v39  ;;  %5765 = vmatprep.mubr.msk.f32.mxu0 %vm816_vm1, %v8285_v46  ;;  %v8307_v39 = vld [vmem:[#allocation66_spill] sm:$0xff] }
  0xc6   : > { %5715 = vmatprep.mubr.msk.f32.mxu1 %vm816_vm1, %v8284_v41 }
  0xc8   : > { %5766 = vmatmul.mubr.msk.f32.gmra.mxu0 %vm816_vm1, %v6600_v48  ;;  %v8293_v48 = vld [vmem:[#allocation48_spill] sm:$0xff] }
  0xc9   : > { %5716 = vmatmul.mubr.msk.f32.gmra.mxu1 %vm816_vm1, %v2807_v62  ;;  %5768 = vmatprep.mubr.msk.f32.mxu0 %vm816_vm1, %v8289_v11  ;;  %v8312_v11 = vld [vmem:[#allocation76_spill] sm:$0xff] }
  0xca   : > { %5718 = vmatprep.mubr.msk.f32.mxu1 %vm816_vm1, %v8288_v58 }
  0xcc   : > { %5769 = vmatmul.mubr.msk.f32.gmra.mxu0 %vm816_vm1, %v6634_v18  ;;  %v8297_v18 = vld [vmem:[#allocation54_spill] sm:$0xff] }
  0xcd   : > { %5719 = vmatmul.mubr.msk.f32.gmra.mxu1 %vm816_vm1, %v2809_v57  ;;  %5771 = vmatprep.mubr.msk.f32.mxu0 %vm816_vm1, %v8293_v48  ;;  %v8311_v57 = vld [vmem:[#allocation70_spill] sm:$0xff] }
  0xce   : > { %5721 = vmatprep.mubr.msk.f32.mxu1 %vm816_vm1, %v8292_v7 }
  0xd0   : > { %5772 = vmatmul.mubr.msk.f32.gmra.mxu0 %vm816_vm1, %v8243_v37  ;;  %v8299_v37 = vld [vmem:[#allocation53_spill] sm:$0xff] }
  0xd1   : > { %5722 = vmatmul.mubr.msk.f32.gmra.mxu1 %vm816_vm1, %v2811_v2  ;;  %5774 = vmatprep.mubr.msk.f32.mxu0 %vm816_vm1, %v8297_v18  ;;  %v2815_v9 = vmul.f32 %v8299_v37, %v8298_v10  ;;  %v3246_v18 = vmul.f32 %v8259_v3, %v7000_v49  ;;  %v7214_v3 = vld [vmem:[%s6099_s24 + $0x10a] sm:$0xff] }
  0xd2   : > { %5724 = vmatprep.mubr.msk.f32.mxu1 %vm816_vm1, %v8296_v55  ;;  %v8315_v55 = vld [vmem:[#allocation79_spill] sm:$0xff] }
  0xd4   : > { %v7112_v43 = vpop.f32.mrf.mxu0  ;;  %5775 = vmatmul.mubr.msk.f32.gmra.mxu0 %vm816_vm1, %v6702_v63  ;;  %v8302_v63 = vld [vmem:[#allocation65_spill] sm:$0xff] }
  0xd5   : > { %v7114_v34 = vpop.f32.mrf.mxu1  ;;  %5725 = vmatmul.mubr.msk.f32.gmra.mxu1 %vm816_vm1, %v2813_v45  ;;  %5777 = vmatprep.mubr.msk.f32.mxu0 %vm816_vm1, %v8301_v16  ;;  %v2817_v30 = vmul.f32 %v8303_v29, %v8302_v63 }
  0xd6   : > { %5727 = vmatprep.mubr.msk.f32.mxu1 %vm816_vm1, %v8300_v14  ;;  %v7125_v21 = vpop.f32.mrf.mxu0  ;;  %v3216_v14 = vld [vmem:[%s6099_s24 + $0x110] sm:$0xff] }
  0xd7   : > { %v7127_v23 = vpop.f32.mrf.mxu1 }
  0xd8   : > { %v7129_v25 = vpop.f32.mrf.mxu0  ;;  %5778 = vmatmul.mubr.msk.f32.gmra.mxu0 %vm816_vm1, %v6736_v20  ;;  %v8306_v20 = vld [vmem:[#allocation69_spill] sm:$0xff] }
  0xd9   : > { %v7131_v35 = vpop.f32.mrf.mxu1  ;;  %5728 = vmatmul.mubr.msk.f32.gmra.mxu1 %vm816_vm1, %v2815_v9  ;;  %5780 = vmatprep.mubr.msk.f32.mxu0 %vm816_vm1, %v8305_v61  ;;  %v2819_v44 = vmul.f32 %v8307_v39, %v8306_v20  ;;  %v3608_v20 = vld [vmem:[%s6099_s24 + $0x21] sm:$0xff] }
  0xda   : > { %5730 = vmatprep.mubr.msk.f32.mxu1 %vm816_vm1, %v8304_v50  ;;  %v7142_v33 = vpop.f32.mrf.mxu0 }
  0xdb   : > { %v7144_v6 = vpop.f32.mrf.mxu1 }
  0xdc   : > { %v7146_v1 = vpop.f32.mrf.mxu0  ;;  %5781 = vmatmul.mubr.msk.f32.gmra.mxu0 %vm816_vm1, %v6769_v24  ;;  %v8310_v24 = vld [vmem:[#allocation73_spill] sm:$0xff] }
  0xdd   : > { %v7148_v26 = vpop.f32.mrf.mxu1  ;;  %5731 = vmatmul.mubr.msk.f32.gmra.mxu1 %vm816_vm1, %v2817_v30  ;;  %5783 = vmatprep.mubr.msk.f32.mxu0 %vm816_vm1, %v8309_v47  ;;  %v2821_v58 = vmul.f32 %v8311_v57, %v8310_v24  ;;  %v3609_v47 = vld [vmem:[%s6099_s24 + $0x29] sm:$0xff]  ;;  %v4001_v24 = vld [vmem:[%s6099_s24 + $0x3a] sm:$0xff] }
  0xde   : > { %5733 = vmatprep.mubr.msk.f32.mxu1 %vm816_vm1, %v8308_v0  ;;  %v7159_v62 = vpop.f32.mrf.mxu0 }
  0xdf   : > { %v7161_v41 = vpop.f32.mrf.mxu1 }
  0xe0   : > { %v7163_v46 = vpop.f32.mrf.mxu0  ;;  %5784 = vmatmul.mubr.msk.f32.gmra.mxu0 %vm816_vm1, %v8256_v36  ;;  %v8314_v36 = vld [vmem:[#allocation74_spill] sm:$0xff] }
  0xe1   : > { %v7165_v42 = vpop.f32.mrf.mxu1  ;;  %5734 = vmatmul.mubr.msk.f32.gmra.mxu1 %vm816_vm1, %v2819_v44  ;;  %5786 = vmatprep.mubr.msk.f32.mxu0 %vm816_vm1, %v8313_v12  ;;  %v2823_v45 = vmul.f32 %v8314_v36, %v6806_v17  ;;  %v2825_v17 = vmul.f32 %v6809_v28, %v6835_v40  ;;  %v3998_v44 = vld [vmem:[%s6099_s24 + $0x22] sm:$0xff]  ;;  %v3610_v12 = vld [vmem:[%s6099_s24 + $0x31] sm:$0xff] }
  0xe2   : > { %5736 = vmatprep.mubr.msk.f32.mxu1 %vm816_vm1, %v8312_v11  ;;  %v7176_v2 = vpop.f32.mrf.mxu0 }
  0xe3   : > { %v7178_v7 = vpop.f32.mrf.mxu1 }
  0xe4   : > { %v7180_v48 = vpop.f32.mrf.mxu0  ;;  %5787 = vmatmul.mubr.msk.f32.gmra.mxu0 %vm816_vm1, %v6830_v51 }
  0xe5   : > { %v7182_v60 = vpop.f32.mrf.mxu1  ;;  %5737 = vmatmul.mubr.msk.f32.gmra.mxu1 %vm816_vm1, %v2821_v58  ;;  %5789 = vmatprep.mubr.msk.f32.mxu0 %vm816_vm1, %v8315_v55 }
  0xe6   : > { %5739 = vmatprep.mubr.msk.f32.mxu1 %vm816_vm1, %v6816_v4  ;;  %v7195_v10 = vpop.f32.mrf.mxu0  ;;  %v3248_v4 = vmul.f32 %v6819_v32, %v3216_v14  ;;  %v2827_v32 = vmul.f32 %v6838_v8, %v7214_v3  ;;  %v8318_v14 = vld [vmem:[#allocation11_spill] sm:$0xff] }
  0xe7   : > { %v7197_v9 = vpop.f32.mrf.mxu1 }
  0xe8   : > { %v7200_v51 = vpop.f32.mrf.mxu0  ;;  %5790 = vmatmul.mubr.msk.f32.gmra.mxu0 %vm816_vm1, %v6852_v5  ;;  %v7221_v5 = vld [vmem:[%s6099_s24 + $0x102] sm:$0xff] }
  0xe9   : > { %v7202_v16 = vpop.f32.mrf.mxu1  ;;  %5740 = vmatmul.mubr.msk.f32.gmra.mxu1 %vm816_vm1, %v2823_v45  ;;  %5792 = vmatprep.mubr.msk.f32.mxu0 %vm816_vm1, %v3246_v18  ;;  %v4000_v45 = vld [vmem:[%s6099_s24 + $0x32] sm:$0xff] }
  0xea   : > { %5742 = vmatprep.mubr.msk.f32.mxu1 %vm816_vm1, %v6841_v22  ;;  %v7216_v49 = vpop.f32.mrf.mxu0  ;;  %v3217_v22 = vld [vmem:[%s6099_s24 + $0x118] sm:$0xff] }
  0xeb   : > { %v7218_v63 = vpop.f32.mrf.mxu1 }
  0xec   : > { %v7223_v30 = vpop.f32.mrf.mxu0  ;;  %5793 = vmatmul.mubr.msk.f32.gmra.mxu0 %vm816_vm1, %v7022_v15 }
  0xed   : > { %v7225_v40 = vpop.f32.mrf.mxu1  ;;  %5743 = vmatmul.mubr.msk.f32.gmra.mxu1 %vm816_vm1, %v2825_v17  ;;  %5795 = vmatprep.mubr.msk.f32.mxu0 %vm816_vm1, %v3248_v4  ;;  %v4033_v17 = vmul.f32 %v8267_v19, %v4001_v24 }
  0xee   : > { %5745 = vmatprep.mubr.msk.f32.mxu1 %vm816_vm1, %v7221_v5  ;;  %v7236_v50 = vpop.f32.mrf.mxu0 }
  0xef   : > { %v7238_v61 = vpop.f32.mrf.mxu1 }
  0xf0   : > { %v7242_v0 = vpop.f32.mrf.mxu0  ;;  %5796 = vmatmul.mubr.msk.f32.gmra.mxu0 %vm816_vm1, %v3217_v22  ;;  %v4003_v22 = vld [vmem:[%s6099_s24 + $0x4a] sm:$0xff] }
  0xf1   : > { %v7244_v15 = vpop.f32.mrf.mxu1  ;;  %5746 = vmatmul.mubr.msk.f32.gmra.mxu1 %vm816_vm1, %v2827_v32  ;;  %5850 = vmatprep.mubr.msk.f32.mxu0 %vm816_vm1, %v3998_v44  ;;  %v3611_v32 = vld [vmem:[%s6099_s24 + $0x39] sm:$0xff] }
  0xf2   : > { %8316 = vst [vmem:[#allocation2_spill] sm:$0xff] %v7244_v15  ;;  %5800 = vmatprep.mubr.msk.f32.mxu1 %vm816_vm1, %v3608_v20  ;;  %v7252_v58 = vpop.f32.mrf.mxu0  ;;  %v4002_v15 = vld [vmem:[%s6099_s24 + $0x42] sm:$0xff] }
  0xf3   : > { %v7254_v11 = vpop.f32.mrf.mxu1 }
  0xf4   : > { %8317 = vst [vmem:[#allocation3_spill] sm:$0xff] %v7254_v11  ;;  %v5552_v18 = vpop.f32.mrf.mxu0  ;;  %5851 = vmatmul.mubr.msk.f32.vlgmr.msra.gmra.mxu0 %vm816_vm1, %v8318_v14  ;;  %v3612_v11 = vld [vmem:[%s6099_s24 + $0x41] sm:$0xff] }
  0xf5   : > { %v5502_v55 = vpop.f32.mrf.mxu1  ;;  %5801 = vmatmul.mubr.msk.f32.vlgmr.msra.gmra.mxu1 %vm816_vm1, %v3609_v47  ;;  %5853 = vmatprep.mubr.msk.f32.mxu0 %vm816_vm1, %v4000_v45  ;;  %v4005_v14 = vld [vmem:[%s6099_s24 + $0x5a] sm:$0xff] }
  0xf6   : > { %v1313_v4 = vadd.f32 %v5502_v55, %v7112_v43  ;;  %5803 = vmatprep.mubr.msk.f32.mxu1 %vm816_vm1, %v3610_v12  ;;  %v1761_v44 = vpop.f32.mrf.mxu0  ;;  %v4035_v12 = vmul.f32 %v8271_v27, %v4003_v22 }
  0xf7   : > { %v1307_v20 = vpop.f32.mrf.mxu1 }
  0xf8   : > { %v7269_v47 = vadd.f32 %v5552_v18, %v1313_v4  ;;  %v1308_v19 = vadd.f32 %v1307_v20, %v7125_v21  ;;  %v5555_v43 = vpop.f32.mrf.mxu0  ;;  %5854 = vmatmul.mubr.msk.f32.gmra.mxu0 %vm816_vm1, %v4033_v17  ;;  %v3613_v18 = vld [vmem:[%s6099_s24 + $0x49] sm:$0xff]  ;;  %v3614_v20 = vld [vmem:[%s6099_s24 + $0x51] sm:$0xff] }
  0xf9   : > { %v5505_v24 = vpop.f32.mrf.mxu1  ;;  %5804 = vmatmul.mubr.msk.f32.gmra.mxu1 %vm816_vm1, %v3611_v32  ;;  %5856 = vmatprep.mubr.msk.f32.mxu0 %vm816_vm1, %v4002_v15  ;;  %v4004_v32 = vld [vmem:[%s6099_s24 + $0x52] sm:$0xff]  ;;  %v4037_v15 = vmul.f32 %v8275_v31, %v4005_v14 }
  0xfa   : > { %v7275_v45 = vadd.f32 %v1761_v44, %v1308_v19  ;;  %v1323_v55 = vadd.f32 %v5505_v24, %v7129_v25  ;;  %5806 = vmatprep.mubr.msk.f32.mxu1 %vm816_vm1, %v3612_v11  ;;  %v1771_v4 = vpop.f32.mrf.mxu0  ;;  %v3615_v19 = vld [vmem:[%s6099_s24 + $0x59] sm:$0xff]  ;;  %v4007_v24 = vld [vmem:[%s6099_s24 + $0x6a] sm:$0xff] }
  0xfb   : > { %v1317_v21 = vpop.f32.mrf.mxu1 }
  0xfc   : > { %v7284_v17 = vadd.f32 %v5555_v43, %v1323_v55  ;;  %v1318_v27 = vadd.f32 %v1317_v21, %v7142_v33  ;;  %v5558_v25 = vpop.f32.mrf.mxu0  ;;  %5857 = vmatmul.mubr.msk.f32.gmra.mxu0 %vm816_vm1, %v4035_v12  ;;  %v3616_v55 = vld [vmem:[%s6099_s24 + $0x61] sm:$0xff]  ;;  %v4039_v21 = vmul.f32 %v8279_v38, %v4007_v24 }
  0xfd   : > { %v5508_v22 = vpop.f32.mrf.mxu1  ;;  %5807 = vmatmul.mubr.msk.f32.gmra.mxu1 %vm816_vm1, %v3613_v18  ;;  %5859 = vmatprep.mubr.msk.f32.mxu0 %vm816_vm1, %v4004_v32  ;;  %v4006_v18 = vld [vmem:[%s6099_s24 + $0x62] sm:$0xff] }
  0xfe   : > { %v7290_v11 = vadd.f32 %v1771_v4, %v1318_v27  ;;  %v1333_v44 = vadd.f32 %v5508_v22, %v7146_v1  ;;  %5809 = vmatprep.mubr.msk.f32.mxu1 %vm816_vm1, %v3614_v20  ;;  %v1781_v43 = vpop.f32.mrf.mxu0  ;;  %v3617_v32 = vld [vmem:[%s6099_s24 + $0x69] sm:$0xff]  ;;  %v4009_v27 = vld [vmem:[%s6099_s24 + $0x7a] sm:$0xff] }
  0xff   : > { %v1327_v33 = vpop.f32.mrf.mxu1  ;;  %v4041_v24 = vmul.f32 %v8283_v54, %v4009_v27 }
 0x100   : > { %v7299_v12 = vadd.f32 %v5558_v25, %v1333_v44  ;;  %v1328_v31 = vadd.f32 %v1327_v33, %v7159_v62  ;;  %v5561_v1 = vpop.f32.mrf.mxu0  ;;  %5860 = vmatmul.mubr.msk.f32.gmra.mxu0 %vm816_vm1, %v4037_v15  ;;  %v3618_v25 = vld [vmem:[%s6099_s24 + $0x71] sm:$0xff] }
 0x101   : > { %v5511_v14 = vpop.f32.mrf.mxu1  ;;  %5810 = vmatmul.mubr.msk.f32.gmra.mxu1 %vm816_vm1, %v3615_v19  ;;  %5862 = vmatprep.mubr.msk.f32.mxu0 %vm816_vm1, %v4006_v18  ;;  %v4008_v44 = vld [vmem:[%s6099_s24 + $0x72] sm:$0xff]  ;;  %v4011_v18 = vld [vmem:[%s6099_s24 + $0x8a] sm:$0xff] }
 0x102   : > { %v7305_v4 = vadd.f32 %v1781_v43, %v1328_v31  ;;  %v1343_v20 = vadd.f32 %v5511_v14, %v7163_v46  ;;  %5812 = vmatprep.mubr.msk.f32.mxu1 %vm816_vm1, %v3616_v55  ;;  %v1791_v22 = vpop.f32.mrf.mxu0  ;;  %v3619_v55 = vld [vmem:[%s6099_s24 + $0x79] sm:$0xff]  ;;  %v3620_v14 = vld [vmem:[%s6099_s24 + $0x81] sm:$0xff] }
 0x103   : > { %v1337_v62 = vpop.f32.mrf.mxu1 }
 0x104   : > { %v7314_v15 = vadd.f32 %v5561_v1, %v1343_v20  ;;  %v1338_v38 = vadd.f32 %v1337_v62, %v7176_v2  ;;  %v5564_v46 = vpop.f32.mrf.mxu0  ;;  %5863 = vmatmul.mubr.msk.f32.gmra.mxu0 %vm816_vm1, %v4039_v21  ;;  %v4010_v1 = vld [vmem:[%s6099_s24 + $0x82] sm:$0xff] }
 0x105   : > { %v5514_v19 = vpop.f32.mrf.mxu1  ;;  %5813 = vmatmul.mubr.msk.f32.gmra.mxu1 %vm816_vm1, %v3617_v32  ;;  %5865 = vmatprep.mubr.msk.f32.mxu0 %vm816_vm1, %v4008_v44  ;;  %v4043_v32 = vmul.f32 %v8287_v56, %v4011_v18 }
 0x106   : > { %v7320_v33 = vadd.f32 %v1791_v22, %v1338_v38  ;;  %v1353_v43 = vadd.f32 %v5514_v19, %v7180_v48  ;;  %5815 = vmatprep.mubr.msk.f32.mxu1 %vm816_vm1, %v3618_v25  ;;  %v1801_v31 = vpop.f32.mrf.mxu0  ;;  %v3621_v22 = vld [vmem:[%s6099_s24 + $0x89] sm:$0xff]  ;;  %v4013_v25 = vld [vmem:[%s6099_s24 + $0x9a] sm:$0xff]  ;;  %v3622_v38 = vld [vmem:[%s6099_s24 + $0x91] sm:$0xff] }
 0x107   : > { %v1347_v2 = vpop.f32.mrf.mxu1  ;;  %v4012_v19 = vld [vmem:[%s6099_s24 + $0x92] sm:$0xff] }
 0x108   : > { %v7329_v21 = vadd.f32 %v5564_v46, %v1353_v43  ;;  %v1348_v54 = vadd.f32 %v1347_v2, %v7195_v10  ;;  %v5567_v48 = vpop.f32.mrf.mxu0  ;;  %5866 = vmatmul.mubr.msk.f32.gmra.mxu0 %vm816_vm1, %v4041_v24  ;;  %v4045_v43 = vmul.f32 %v8291_v13, %v4013_v25  ;;  %v3623_v2 = vld [vmem:[%s6099_s24 + $0x99] sm:$0xff]  ;;  %v3625_v25 = vld [vmem:[%s6099_s24 + $0xa9] sm:$0xff] }
 0x109   : > { %v5517_v20 = vpop.f32.mrf.mxu1  ;;  %5816 = vmatmul.mubr.msk.f32.gmra.mxu1 %vm816_vm1, %v3619_v55  ;;  %5868 = vmatprep.mubr.msk.f32.mxu0 %vm816_vm1, %v4010_v1  ;;  %v3624_v1 = vld [vmem:[%s6099_s24 + $0xa1] sm:$0xff] }
 0x10a   : > { %v7335_v27 = vadd.f32 %v1801_v31, %v1348_v54  ;;  %v1363_v62 = vadd.f32 %v5517_v20, %v7200_v51  ;;  %5818 = vmatprep.mubr.msk.f32.mxu1 %vm816_vm1, %v3620_v14  ;;  %v1811_v44 = vpop.f32.mrf.mxu0  ;;  %v4015_v31 = vld [vmem:[%s6099_s24 + $0xaa] sm:$0xff]  ;;  %v4014_v54 = vld [vmem:[%s6099_s24 + $0xa2] sm:$0xff] }
 0x10b   : > { %v1357_v10 = vpop.f32.mrf.mxu1 }
 0x10c   : > { %v7344_v46 = vadd.f32 %v5567_v48, %v1363_v62  ;;  %v1358_v56 = vadd.f32 %v1357_v10, %v7216_v49  ;;  %v5570_v51 = vpop.f32.mrf.mxu0  ;;  %5869 = vmatmul.mubr.msk.f32.gmra.mxu0 %vm816_vm1, %v4043_v32  ;;  %v4047_v32 = vmul.f32 %v8295_v52, %v4015_v31  ;;  %v4017_v10 = vld [vmem:[%s6099_s24 + $0xba] sm:$0xff]  ;;  %v4019_v31 = vld [vmem:[%s6099_s24 + $0xca] sm:$0xff] }
 0x10d   : > { %v5520_v24 = vpop.f32.mrf.mxu1  ;;  %5819 = vmatmul.mubr.msk.f32.gmra.mxu1 %vm816_vm1, %v3621_v22  ;;  %5871 = vmatprep.mubr.msk.f32.mxu0 %vm816_vm1, %v4012_v19  ;;  %v4016_v19 = vld [vmem:[%s6099_s24 + $0xb2] sm:$0xff] }
 0x10e   : > { %v7350_v55 = vadd.f32 %v1811_v44, %v1358_v56  ;;  %v1373_v18 = vadd.f32 %v5520_v24, %v7223_v30  ;;  %5821 = vmatprep.mubr.msk.f32.mxu1 %vm816_vm1, %v3622_v38  ;;  %v1821_v14 = vpop.f32.mrf.mxu0  ;;  %v3626_v38 = vld [vmem:[%s6099_s24 + $0xb1] sm:$0xff] }
 0x10f   : > { %v1367_v49 = vpop.f32.mrf.mxu1 }
 0x110   : > { %v7359_v20 = vadd.f32 %v5570_v51, %v1373_v18  ;;  %v1368_v13 = vadd.f32 %v1367_v49, %v7236_v50  ;;  %v5573_v30 = vpop.f32.mrf.mxu0  ;;  %5872 = vmatmul.mubr.msk.f32.gmra.mxu0 %vm816_vm1, %v4045_v43  ;;  %v4049_v51 = vmul.f32 %v8299_v37, %v4017_v10 }
 0x111   : > { %v5523_v48 = vpop.f32.mrf.mxu1  ;;  %5822 = vmatmul.mubr.msk.f32.gmra.mxu1 %vm816_vm1, %v3623_v2  ;;  %5874 = vmatprep.mubr.msk.f32.mxu0 %vm816_vm1, %v4014_v54  ;;  %v3627_v2 = vld [vmem:[%s6099_s24 + $0xb9] sm:$0xff] }
 0x112   : > { %v7365_v62 = vadd.f32 %v1821_v14, %v1368_v13  ;;  %v1383_v22 = vadd.f32 %v5523_v48, %v7242_v0  ;;  %5824 = vmatprep.mubr.msk.f32.mxu1 %vm816_vm1, %v3624_v1  ;;  %v1831_v44 = vpop.f32.mrf.mxu0  ;;  %v3628_v14 = vld [vmem:[%s6099_s24 + $0xc1] sm:$0xff]  ;;  %v4051_v48 = vmul.f32 %v8303_v29, %v4019_v31 }
 0x113   : > { %v1377_v50 = vpop.f32.mrf.mxu1  ;;  %v4018_v1 = vld [vmem:[%s6099_s24 + $0xc2] sm:$0xff] }
 0x114   : > { %v7374_v56 = vadd.f32 %v5573_v30, %v1383_v22  ;;  %v1378_v52 = vadd.f32 %v1377_v50, %v7252_v58  ;;  %v5576_v0 = vpop.f32.mrf.mxu0  ;;  %5875 = vmatmul.mubr.msk.f32.gmra.mxu0 %vm816_vm1, %v4047_v32  ;;  %v3629_v22 = vld [vmem:[%s6099_s24 + $0xc9] sm:$0xff]  ;;  %v3630_v50 = vld [vmem:[%s6099_s24 + $0xd1] sm:$0xff]  ;;  %v3632_v31 = vld [vmem:[%s6099_s24 + $0xe1] sm:$0xff] }
 0x115   : > { %v5526_v24 = vpop.f32.mrf.mxu1  ;;  %5825 = vmatmul.mubr.msk.f32.gmra.mxu1 %vm816_vm1, %v3625_v25  ;;  %5877 = vmatprep.mubr.msk.f32.mxu0 %vm816_vm1, %v4016_v19  ;;  %v4021_v25 = vld [vmem:[%s6099_s24 + $0xda] sm:$0xff] }
 0x116   : > { %v7380_v43 = vadd.f32 %v1831_v44, %v1378_v52  ;;  %v1393_v18 = vadd.f32 %v5526_v24, %v7114_v34  ;;  %5827 = vmatprep.mubr.msk.f32.mxu1 %vm816_vm1, %v3626_v38  ;;  %v1841_v49 = vpop.f32.mrf.mxu0  ;;  %v4020_v44 = vld [vmem:[%s6099_s24 + $0xd2] sm:$0xff]  ;;  %v4053_v52 = vmul.f32 %v8307_v39, %v4021_v25 }
 0x117   : > { %v1387_v58 = vpop.f32.mrf.mxu1  ;;  %v4024_v25 = vld [vmem:[%s6099_s24 + $0xf2] sm:$0xff] }
 0x118   : > { %v7389_v54 = vadd.f32 %v5576_v0, %v1393_v18  ;;  %v1388_v37 = vadd.f32 %v1387_v58, %v7127_v23  ;;  %v5579_v34 = vpop.f32.mrf.mxu0  ;;  %5878 = vmatmul.mubr.msk.f32.gmra.mxu0 %vm816_vm1, %v4049_v51  ;;  %v3631_v51 = vld [vmem:[%s6099_s24 + $0xd9] sm:$0xff]  ;;  %v4023_v18 = vld [vmem:[%s6099_s24 + $0xea] sm:$0xff]  ;;  %v4022_v58 = vld [vmem:[%s6099_s24 + $0xe2] sm:$0xff] }
 0x119   : > { %v5529_v13 = vpop.f32.mrf.mxu1  ;;  %5828 = vmatmul.mubr.msk.f32.gmra.mxu1 %vm816_vm1, %v3627_v2  ;;  %5880 = vmatprep.mubr.msk.f32.mxu0 %vm816_vm1, %v4018_v1  ;;  %v4055_v1 = vmul.f32 %v8311_v57, %v4023_v18 }
 0x11a   : > { %v7395_v30 = vadd.f32 %v1841_v49, %v1388_v37  ;;  %v1403_v32 = vadd.f32 %v5529_v13, %v7131_v35  ;;  %5830 = vmatprep.mubr.msk.f32.mxu1 %vm816_vm1, %v3628_v14  ;;  %v1851_v10 = vpop.f32.mrf.mxu0 }
 0x11b   : > { %v1397_v23 = vpop.f32.mrf.mxu1 }
 0x11c   : > { %v7404_v38 = vadd.f32 %v5579_v34, %v1403_v32  ;;  %v1398_v29 = vadd.f32 %v1397_v23, %v7144_v6  ;;  %v5582_v35 = vpop.f32.mrf.mxu0  ;;  %5881 = vmatmul.mubr.msk.f32.gmra.mxu0 %vm816_vm1, %v4051_v48  ;;  %v3633_v34 = vld [vmem:[%s6099_s24 + $0xe9] sm:$0xff]  ;;  %v4025_v48 = vld [vmem:[%s6099_s24 + $0xfa] sm:$0xff] }
 0x11d   : > { %v5532_v19 = vpop.f32.mrf.mxu1  ;;  %5831 = vmatmul.mubr.msk.f32.gmra.mxu1 %vm816_vm1, %v3629_v22  ;;  %5883 = vmatprep.mubr.msk.f32.mxu0 %vm816_vm1, %v4020_v44  ;;  %v3634_v22 = vld [vmem:[%s6099_s24 + $0xf1] sm:$0xff] }
 0x11e   : > { %v7410_v24 = vadd.f32 %v1851_v10, %v1398_v29  ;;  %v1413_v0 = vadd.f32 %v5532_v19, %v7148_v26  ;;  %5833 = vmatprep.mubr.msk.f32.mxu1 %vm816_vm1, %v3630_v50  ;;  %v1861_v2 = vpop.f32.mrf.mxu0  ;;  %v3635_v19 = vld [vmem:[%s6099_s24 + $0xf9] sm:$0xff] }
 0x11f   : > { %v1407_v6 = vpop.f32.mrf.mxu1 }
 0x120   : > { %v7419_v49 = vadd.f32 %v5582_v35, %v1413_v0  ;;  %v1408_v39 = vadd.f32 %v1407_v6, %v7161_v41  ;;  %v5585_v26 = vpop.f32.mrf.mxu0  ;;  %5884 = vmatmul.mubr.msk.f32.gmra.mxu0 %vm816_vm1, %v4053_v52 }
 0x121   : > { %v5535_v14 = vpop.f32.mrf.mxu1  ;;  %5834 = vmatmul.mubr.msk.f32.gmra.mxu1 %vm816_vm1, %v3631_v51  ;;  %5886 = vmatprep.mubr.msk.f32.mxu0 %vm816_vm1, %v4022_v58  ;;  %v3638_v58 = vld [vmem:[%s6099_s24 + $0x111] sm:$0xff] }
 0x122   : > { %v7425_v37 = vadd.f32 %v1861_v2, %v1408_v39  ;;  %v1423_v13 = vadd.f32 %v5535_v14, %v7165_v42  ;;  %5836 = vmatprep.mubr.msk.f32.mxu1 %vm816_vm1, %v3632_v31  ;;  %v1871_v32 = vpop.f32.mrf.mxu0  ;;  %v4057_v42 = vmul.f32 %v8314_v36, %v4025_v48  ;;  %v4028_v39 = vld [vmem:[%s6099_s24 + $0x112] sm:$0xff] }
 0x123   : > { %v1417_v41 = vpop.f32.mrf.mxu1 }
 0x124   : > { %v7434_v23 = vadd.f32 %v5585_v26, %v1423_v13  ;;  %v1418_v10 = vadd.f32 %v1417_v41, %v7178_v7  ;;  %v5588_v50 = vpop.f32.mrf.mxu0  ;;  %5887 = vmatmul.mubr.msk.f32.gmra.mxu0 %vm816_vm1, %v4055_v1  ;;  %v3639_v1 = vld [vmem:[%s6099_s24 + $0x119] sm:$0xff] }
 0x125   : > { %v5538_v57 = vpop.f32.mrf.mxu1  ;;  %5837 = vmatmul.mubr.msk.f32.gmra.mxu1 %vm816_vm1, %v3633_v34  ;;  %5889 = vmatprep.mubr.msk.f32.mxu0 %vm816_vm1, %v4024_v25 }
 0x126   : > { %v7440_v44 = vadd.f32 %v1871_v32, %v1418_v10  ;;  %v1433_v29 = vadd.f32 %v5538_v57, %v7182_v60  ;;  %5839 = vmatprep.mubr.msk.f32.mxu1 %vm816_vm1, %v3634_v22  ;;  %v1881_v7 = vpop.f32.mrf.mxu0  ;;  %v4059_v60 = vmul.f32 %v6809_v28, %v7214_v3  ;;  %v8320_v57 = vld [vmem:[#allocation3_spill] sm:$0xff] }
 0x127   : > { %v1427_v35 = vpop.f32.mrf.mxu1 }
 0x128   : > { %v7446_v52 = vadd.f32 %v5588_v50, %v1433_v29  ;;  %v1428_v0 = vadd.f32 %v1427_v35, %v7197_v9  ;;  %v5591_v36 = vpop.f32.mrf.mxu0  ;;  %5890 = vmatmul.mubr.msk.f32.gmra.mxu0 %vm816_vm1, %v4057_v42  ;;  %v4029_v9 = vld [vmem:[%s6099_s24 + $0x11a] sm:$0xff] }
 0x129   : > { %v5541_v51 = vpop.f32.mrf.mxu1  ;;  %5840 = vmatmul.mubr.msk.f32.gmra.mxu1 %vm816_vm1, %v3635_v19  ;;  %5892 = vmatprep.mubr.msk.f32.mxu0 %vm816_vm1, %v7221_v5 }
 0x12a   : > { %v7453_v18 = vadd.f32 %v1881_v7, %v1428_v0  ;;  %v1443_v6 = vadd.f32 %v5541_v51, %v7202_v16  ;;  %5842 = vmatprep.mubr.msk.f32.mxu1 %vm816_vm1, %v7012_v53  ;;  %v1891_v31 = vpop.f32.mrf.mxu0  ;;  %v4061_v53 = vmul.f32 %v6838_v8, %v4029_v9 }
 0x12b   : > { %v1437_v2 = vpop.f32.mrf.mxu1 }
 0x12c   : > { %v7463_v14 = vadd.f32 %v5591_v36, %v1443_v6  ;;  %v1438_v28 = vadd.f32 %v1437_v2, %v7218_v63  ;;  %v5594_v26 = vpop.f32.mrf.mxu0  ;;  %5893 = vmatmul.mubr.msk.f32.gmra.mxu0 %vm816_vm1, %v4059_v60 }
 0x12d   : > { %v5544_v3 = vpop.f32.mrf.mxu1  ;;  %5843 = vmatmul.mubr.msk.f32.gmra.mxu1 %vm816_vm1, %v7025_v59  ;;  %5895 = vmatprep.mubr.msk.f32.mxu0 %vm816_vm1, %v4028_v39 }
 0x12e   : > { %v7470_v16 = vadd.f32 %v1891_v31, %v1438_v28  ;;  %v1453_v5 = vadd.f32 %v5544_v3, %v7225_v40  ;;  %5845 = vmatprep.mubr.msk.f32.mxu1 %vm816_vm1, %v3638_v58  ;;  %v1901_v63 = vpop.f32.mrf.mxu0  ;;  %v8319_v40 = vld [vmem:[#allocation2_spill] sm:$0xff] }
 0x12f   : > { %v1447_v13 = vpop.f32.mrf.mxu1 }
 0x130   : > { %v7476_v34 = vadd.f32 %v5594_v26, %v1453_v5  ;;  %v1448_v48 = vadd.f32 %v1447_v13, %v7238_v61  ;;  %v5597_v41 = vpop.f32.mrf.mxu0  ;;  %5896 = vmatmul.mubr.msk.f32.gmra.mxu0 %vm816_vm1, %v4061_v53 }
 0x131   : > { %v5547_v59 = vpop.f32.mrf.mxu1  ;;  %5846 = vmatmul.mubr.msk.f32.gmra.mxu1 %vm816_vm1, %v3639_v1 }
 0x132   : > { %v7481_v8 = vadd.f32 %v1901_v63, %v1448_v48  ;;  %v1463_v32 = vadd.f32 %v5547_v59, %v8319_v40  ;;  %v1911_v25 = vpop.f32.mrf.mxu0 }
 0x133   : > { %v1457_v22 = vpop.f32.mrf.mxu1 }
 0x134   : > { %v7484_v10 = vadd.f32 %v5597_v41, %v1463_v32  ;;  %v1458_v50 = vadd.f32 %v1457_v22, %v8320_v57  ;;  %v5652_v29 = vpop.f32.mrf.mxu0 }
 0x135   : > { %v5602_v42 = vpop.f32.mrf.mxu1 }
 0x136   : > { %v7487_v19 = vadd.f32 %v1911_v25, %v1458_v50  ;;  %v2343_v61 = vadd.f32 %v5602_v42, %v7269_v47  ;;  %v2573_v7 = vpop.f32.mrf.mxu0 }
 0x137   : > { %v2183_v35 = vpop.f32.mrf.mxu1 }
 0x138   : > { %v7490_v0 = vadd.f32 %v5652_v29, %v2343_v61  ;;  %v2342_v51 = vadd.f32 %v2183_v35, %v7275_v45  ;;  %v5655_v60 = vpop.f32.mrf.mxu0 }
 0x139   : > { %v5605_v36 = vpop.f32.mrf.mxu1 }
 0x13a   : > { %v7493_v6 = vadd.f32 %v2573_v7, %v2342_v51  ;;  %v2345_v9 = vadd.f32 %v5605_v36, %v7284_v17  ;;  %v2583_v31 = vpop.f32.mrf.mxu0 }
 0x13b   : > { %v2193_v2 = vpop.f32.mrf.mxu1 }
 0x13c   : > { %v7496_v58 = vadd.f32 %v5655_v60, %v2345_v9  ;;  %v2344_v39 = vadd.f32 %v2193_v2, %v7290_v11  ;;  %v5658_v47 = vpop.f32.mrf.mxu0 }
 0x13d   : > { %v5608_v28 = vpop.f32.mrf.mxu1 }
 0x13e   : > { %v7499_v3 = vadd.f32 %v2583_v31, %v2344_v39  ;;  %v2347_v26 = vadd.f32 %v5608_v28, %v7299_v12  ;;  %v2593_v45 = vpop.f32.mrf.mxu0 }
 0x13f   : > { %v2203_v53 = vpop.f32.mrf.mxu1 }
 0x140   : > { %v7502_v5 = vadd.f32 %v5658_v47, %v2347_v26  ;;  %v2346_v1 = vadd.f32 %v2203_v53, %v7305_v4  ;;  %v5661_v17 = vpop.f32.mrf.mxu0 }
 0x141   : > { %v5611_v13 = vpop.f32.mrf.mxu1 }
 0x142   : > { %v7505_v63 = vadd.f32 %v2593_v45, %v2346_v1  ;;  %v2349_v48 = vadd.f32 %v5611_v13, %v7314_v15  ;;  %v2603_v11 = vpop.f32.mrf.mxu0 }
 0x143   : > { %v2213_v59 = vpop.f32.mrf.mxu1 }
 0x144   : > { %v7508_v41 = vadd.f32 %v5661_v17, %v2349_v48  ;;  %v2348_v40 = vadd.f32 %v2213_v59, %v7320_v33  ;;  %v5664_v12 = vpop.f32.mrf.mxu0 }
 0x145   : > { %v5614_v32 = vpop.f32.mrf.mxu1 }
 0x146   : > { %v7511_v22 = vadd.f32 %v2603_v11, %v2348_v40  ;;  %v2351_v25 = vadd.f32 %v5614_v32, %v7329_v21  ;;  %v2613_v4 = vpop.f32.mrf.mxu0 }
 0x147   : > { %v2223_v57 = vpop.f32.mrf.mxu1 }
 0x148   : > { %v7514_v50 = vadd.f32 %v5664_v12, %v2351_v25  ;;  %v2350_v42 = vadd.f32 %v2223_v57, %v7335_v27  ;;  %v5667_v15 = vpop.f32.mrf.mxu0 }
 0x149   : > { %v5617_v29 = vpop.f32.mrf.mxu1 }
 0x14a   : > { %v7517_v61 = vadd.f32 %v2613_v4, %v2350_v42  ;;  %v2353_v35 = vadd.f32 %v5617_v29, %v7344_v46  ;;  %v2623_v33 = vpop.f32.mrf.mxu0 }
 0x14b   : > { %v2233_v7 = vpop.f32.mrf.mxu1 }
 0x14c   : > { %v7520_v51 = vadd.f32 %v5667_v15, %v2353_v35  ;;  %v2352_v36 = vadd.f32 %v2233_v7, %v7350_v55  ;;  %v5670_v21 = vpop.f32.mrf.mxu0 }
 0x14d   : > { %v5620_v60 = vpop.f32.mrf.mxu1 }
 0x14e   : > { %v7523_v9 = vadd.f32 %v2623_v33, %v2352_v36  ;;  %v2355_v2 = vadd.f32 %v5620_v60, %v7359_v20  ;;  %v2633_v27 = vpop.f32.mrf.mxu0 }
 0x14f   : > { %v2243_v31 = vpop.f32.mrf.mxu1 }
 0x150   : > { %v7526_v39 = vadd.f32 %v5670_v21, %v2355_v2  ;;  %v2354_v28 = vadd.f32 %v2243_v31, %v7365_v62  ;;  %v5673_v46 = vpop.f32.mrf.mxu0 }
 0x151   : > { %v5623_v47 = vpop.f32.mrf.mxu1 }
 0x152   : > { %v7529_v26 = vadd.f32 %v2633_v27, %v2354_v28  ;;  %v2357_v53 = vadd.f32 %v5623_v47, %v7374_v56  ;;  %v2643_v55 = vpop.f32.mrf.mxu0 }
 0x153   : > { %v2253_v45 = vpop.f32.mrf.mxu1 }
 0x154   : > { %v7532_v1 = vadd.f32 %v5673_v46, %v2357_v53  ;;  %v2356_v13 = vadd.f32 %v2253_v45, %v7380_v43  ;;  %v5676_v20 = vpop.f32.mrf.mxu0 }
 0x155   : > { %v5626_v17 = vpop.f32.mrf.mxu1 }
 0x156   : > { %v7535_v48 = vadd.f32 %v2643_v55, %v2356_v13  ;;  %v2359_v59 = vadd.f32 %v5626_v17, %v7389_v54  ;;  %v2653_v62 = vpop.f32.mrf.mxu0 }
 0x157   : > { %v2263_v11 = vpop.f32.mrf.mxu1 }
 0x158   : > { %v7538_v40 = vadd.f32 %v5676_v20, %v2359_v59  ;;  %v2358_v32 = vadd.f32 %v2263_v11, %v7395_v30  ;;  %v5679_v56 = vpop.f32.mrf.mxu0 }
 0x159   : > { %v5629_v12 = vpop.f32.mrf.mxu1 }
 0x15a   : > { %v7541_v25 = vadd.f32 %v2653_v62, %v2358_v32  ;;  %v2361_v57 = vadd.f32 %v5629_v12, %v7404_v38  ;;  %v2663_v43 = vpop.f32.mrf.mxu0 }
 0x15b   : > { %v2273_v4 = vpop.f32.mrf.mxu1 }
 0x15c   : > { %v7544_v42 = vadd.f32 %v5679_v56, %v2361_v57  ;;  %v2360_v29 = vadd.f32 %v2273_v4, %v7410_v24  ;;  %v5682_v54 = vpop.f32.mrf.mxu0 }
 0x15d   : > { %v5632_v15 = vpop.f32.mrf.mxu1 }
 0x15e   : > { %v7547_v35 = vadd.f32 %v2663_v43, %v2360_v29  ;;  %v2363_v7 = vadd.f32 %v5632_v15, %v7419_v49  ;;  %v2673_v30 = vpop.f32.mrf.mxu0 }
 0x15f   : > { %v2283_v33 = vpop.f32.mrf.mxu1 }
 0x160   : > { %8321 = vst [vmem:[#allocation51_spill] sm:$0xff] %v7547_v35  ;;  %v7550_v36 = vadd.f32 %v5682_v54, %v2363_v7  ;;  %v2362_v60 = vadd.f32 %v2283_v33, %v7425_v37  ;;  %v5685_v38 = vpop.f32.mrf.mxu0 }
 0x161   : > { %v5635_v21 = vpop.f32.mrf.mxu1 }
 0x162   : > { %8322 = vst [vmem:[#allocation50_spill] sm:$0xff] %v7550_v36  ;;  %v7553_v2 = vadd.f32 %v2673_v30, %v2362_v60  ;;  %v2365_v31 = vadd.f32 %v5635_v21, %v7434_v23  ;;  %v2683_v24 = vpop.f32.mrf.mxu0 }
 0x163   : > { %v2293_v27 = vpop.f32.mrf.mxu1 }
 0x164   : > { %8323 = vst [vmem:[#allocation58_spill] sm:$0xff] %v7553_v2  ;;  %v7556_v28 = vadd.f32 %v5685_v38, %v2365_v31  ;;  %v2364_v47 = vadd.f32 %v2293_v27, %v7440_v44  ;;  %v5688_v49 = vpop.f32.mrf.mxu0 }
 0x165   : > { %v5638_v46 = vpop.f32.mrf.mxu1 }
 0x166   : > { %8324 = vst [vmem:[#allocation4_spill] sm:$0xff] %v7556_v28  ;;  %v7559_v53 = vadd.f32 %v2683_v24, %v2364_v47  ;;  %v2367_v45 = vadd.f32 %v5638_v46, %v7446_v52  ;;  %v2693_v37 = vpop.f32.mrf.mxu0 }
 0x167   : > { %v2303_v55 = vpop.f32.mrf.mxu1 }
 0x168   : > { %8325 = vst [vmem:[#allocation5_spill] sm:$0xff] %v7559_v53  ;;  %v7562_v13 = vadd.f32 %v5688_v49, %v2367_v45  ;;  %v2366_v17 = vadd.f32 %v2303_v55, %v7453_v18  ;;  %v5691_v23 = vpop.f32.mrf.mxu0 }
 0x169   : > { %v5641_v20 = vpop.f32.mrf.mxu1 }
 0x16a   : > { %8326 = vst [vmem:[#allocation57_spill] sm:$0xff] %v7562_v13  ;;  %v7565_v59 = vadd.f32 %v2693_v37, %v2366_v17  ;;  %v2369_v11 = vadd.f32 %v5641_v20, %v7463_v14  ;;  %v2703_v44 = vpop.f32.mrf.mxu0 }
 0x16b   : > { %v2313_v62 = vpop.f32.mrf.mxu1 }
 0x16c   : > { %8327 = vst [vmem:[#allocation56_spill] sm:$0xff] %v7565_v59  ;;  %v7568_v32 = vadd.f32 %v5691_v23, %v2369_v11  ;;  %v2368_v12 = vadd.f32 %v2313_v62, %v7470_v16  ;;  %v5694_v52 = vpop.f32.mrf.mxu0 }
 0x16d   : > { %v5644_v56 = vpop.f32.mrf.mxu1 }
 0x16e   : > { %8328 = vst [vmem:[#allocation6_spill] sm:$0xff] %v7568_v32  ;;  %v7571_v57 = vadd.f32 %v2703_v44, %v2368_v12  ;;  %v2371_v4 = vadd.f32 %v5644_v56, %v7476_v34  ;;  %v2713_v18 = vpop.f32.mrf.mxu0 }
 0x16f   : > { %v2323_v43 = vpop.f32.mrf.mxu1 }
 0x170   : > { %8329 = vst [vmem:[#allocation7_spill] sm:$0xff] %v7571_v57  ;;  %v7574_v29 = vadd.f32 %v5694_v52, %v2371_v4  ;;  %v2370_v15 = vadd.f32 %v2323_v43, %v7481_v8  ;;  %v5697_v14 = vpop.f32.mrf.mxu0 }
 0x171   : > { %v5647_v54 = vpop.f32.mrf.mxu1 }
 0x172   : > { %8330 = vst [vmem:[#allocation64_spill] sm:$0xff] %v7574_v29  ;;  %v7577_v7 = vadd.f32 %v2713_v18, %v2370_v15  ;;  %v2373_v33 = vadd.f32 %v5647_v54, %v7484_v10  ;;  %v2723_v16 = vpop.f32.mrf.mxu0 }
 0x173   : > { %v2333_v30 = vpop.f32.mrf.mxu1 }
 0x174   : > { %8331 = vst [vmem:[#allocation63_spill] sm:$0xff] %v7577_v7  ;;  %v7580_v60 = vadd.f32 %v5697_v14, %v2373_v33  ;;  %v2372_v21 = vadd.f32 %v2333_v30, %v7487_v19  ;;  %v7583_v34 = vpop.f32.mrf.mxu0 }
 0x175   : > { %v5702_v38 = vpop.f32.mrf.mxu1 }
 0x176   : > { %8332 = vst [vmem:[#allocation8_spill] sm:$0xff] %v7580_v60  ;;  %v7585_v31 = vadd.f32 %v2723_v16, %v2372_v21  ;;  %v7587_v24 = vpop.f32.mrf.mxu0 }
 0x177   : > { %v2995_v27 = vpop.f32.mrf.mxu1 }
 0x178   : > { %v7589_v47 = vpop.f32.mrf.mxu0 }
 0x179   : > { %v5705_v8 = vpop.f32.mrf.mxu1 }
 0x17a   : > { %v7591_v49 = vpop.f32.mrf.mxu0 }
 0x17b   : > { %v3005_v46 = vpop.f32.mrf.mxu1 }
 0x17c   : > { %v7593_v45 = vpop.f32.mrf.mxu0 }
 0x17d   : > { %v5708_v10 = vpop.f32.mrf.mxu1 }
 0x17e   : > { %v7595_v37 = vpop.f32.mrf.mxu0 }
 0x17f   : > { %v3015_v55 = vpop.f32.mrf.mxu1 }
 0x180   : > { %v7597_v17 = vpop.f32.mrf.mxu0 }
 0x181   : > { %v5711_v19 = vpop.f32.mrf.mxu1 }
 0x182   : > { %v7601_v23 = vpop.f32.mrf.mxu0 }
 0x183   : > { %v7599_v20 = vpop.f32.mrf.mxu1 }
 0x184   : > { %v7605_v62 = vpop.f32.mrf.mxu0 }
 0x185   : > { %v7603_v11 = vpop.f32.mrf.mxu1 }
 0x186   : > { %v7609_v12 = vpop.f32.mrf.mxu0 }
 0x187   : > { %v7607_v44 = vpop.f32.mrf.mxu1 }
 0x188   : > { %v7611_v52 = vpop.f32.mrf.mxu0 }
 0x189   : > { %v5717_v56 = vpop.f32.mrf.mxu1 }
 0x18a   : > { %v7613_v43 = vpop.f32.mrf.mxu0 }
 0x18b   : > { %v3045_v4 = vpop.f32.mrf.mxu1 }
 0x18c   : > { %v7617_v15 = vpop.f32.mrf.mxu0 }
 0x18d   : > { %v7615_v18 = vpop.f32.mrf.mxu1 }
 0x18e   : > { %v7621_v14 = vpop.f32.mrf.mxu0 }
 0x18f   : > { %v7619_v54 = vpop.f32.mrf.mxu1 }
 0x190   : > { %v7625_v30 = vpop.f32.mrf.mxu0 }
 0x191   : > { %v7623_v33 = vpop.f32.mrf.mxu1  ;;  %8333 = vst [vmem:[#allocation9_spill] sm:$0xff] %v7625_v30 }
 0x192   : > { %v7629_v21 = vpop.f32.mrf.mxu0 }
 0x193   : > { %v7627_v16 = vpop.f32.mrf.mxu1  ;;  %8334 = vst [vmem:[#allocation12_spill] sm:$0xff] %v7629_v21 }
 0x194   : > { %v7633_v7 = vpop.f32.mrf.mxu0 }
 0x195   : > { %v7631_v60 = vpop.f32.mrf.mxu1  ;;  %8335 = vst [vmem:[#allocation13_spill] sm:$0xff] %v7633_v7 }
 0x196   : > { %v7637_v57 = vpop.f32.mrf.mxu0 }
 0x197   : > { %v7635_v29 = vpop.f32.mrf.mxu1  ;;  %8336 = vst [vmem:[#allocation78_spill] sm:$0xff] %v7637_v57 }
 0x198   : > { %v7641_v59 = vpop.f32.mrf.mxu0 }
 0x199   : > { %v7639_v32 = vpop.f32.mrf.mxu1  ;;  %8337 = vst [vmem:[#allocation14_spill] sm:$0xff] %v7641_v59 }
 0x19a   : > { %v7645_v53 = vpop.f32.mrf.mxu0 }
 0x19b   : > { %v7643_v13 = vpop.f32.mrf.mxu1  ;;  %8339 = vst [vmem:[#allocation77_spill] sm:$0xff] %v7645_v53 }
 0x19c   : > { %8338 = vst [vmem:[#allocation15_spill] sm:$0xff] %v7643_v13  ;;  %v7649_v2 = vpop.f32.mrf.mxu0 }
 0x19d   : > { %v7647_v28 = vpop.f32.mrf.mxu1  ;;  %8341 = vst [vmem:[#allocation17_spill] sm:$0xff] %v7649_v2 }
 0x19e   : > { %8340 = vst [vmem:[#allocation16_spill] sm:$0xff] %v7647_v28  ;;  %v7653_v35 = vpop.f32.mrf.mxu0 }
 0x19f   : > { %v7651_v36 = vpop.f32.mrf.mxu1  ;;  %8343 = vst [vmem:[#allocation20_spill] sm:$0xff] %v7653_v35 }
 0x1a0   : > { %8342 = vst [vmem:[#allocation18_spill] sm:$0xff] %v7651_v36  ;;  %v7657_v21 = vpop.f32.mrf.mxu0 }
 0x1a1   : > { %v7655_v7 = vpop.f32.mrf.mxu1  ;;  %8345 = vst [vmem:[#allocation30_spill] sm:$0xff] %v7657_v21 }
 0x1a2   : > { %8344 = vst [vmem:[#allocation29_spill] sm:$0xff] %v7655_v7  ;;  %v7661_v30 = vpop.f32.mrf.mxu0 }
 0x1a3   : > { %v7659_v57 = vpop.f32.mrf.mxu1  ;;  %8347 = vst [vmem:[#allocation19_spill] sm:$0xff] %v7661_v30 }
 0x1a4   : > { %8346 = vst [vmem:[#allocation10_spill] sm:$0xff] %v7659_v57  ;;  %v7665_v13 = vpop.f32.mrf.mxu0 }
 0x1a5   : > { %v7663_v59 = vpop.f32.mrf.mxu1  ;;  %8349 = vst [vmem:[#allocation31_spill] sm:$0xff] %v7665_v13  ;;  %v3155_v13 = vadd.f32 %v5702_v38, %v7490_v0  ;;  %v3161_v38 = vadd.f32 %v5711_v19, %v7508_v41  ;;  %v3164_v41 = vadd.f32 %v3045_v4, %v7523_v9  ;;  %v3166_v9 = vadd.f32 %v7619_v54, %v7529_v26 }
 0x1a6   : > { %8348 = vst [vmem:[#allocation22_spill] sm:$0xff] %v7663_v59  ;;  %v7669_v28 = vpop.f32.mrf.mxu0  ;;  %v3170_v54 = vadd.f32 %v7635_v29, %v7541_v25  ;;  %v8363_v25 = vld [vmem:[#allocation51_spill] sm:$0xff] }
 0x1a7   : > { %v7667_v53 = vpop.f32.mrf.mxu1  ;;  %8351 = vst [vmem:[#allocation21_spill] sm:$0xff] %v7669_v28  ;;  %v3154_v28 = vadd.f32 %v2995_v27, %v7493_v6  ;;  %v3158_v6 = vadd.f32 %v3015_v55, %v7505_v63  ;;  %v3165_v63 = vadd.f32 %v5717_v56, %v7520_v51  ;;  %v3167_v51 = vadd.f32 %v7615_v18, %v7526_v39  ;;  %v8364_v29 = vld [vmem:[#allocation15_spill] sm:$0xff] }
 0x1a8   : > { %8350 = vst [vmem:[#allocation24_spill] sm:$0xff] %v7667_v53  ;;  %v7673_v36 = vpop.f32.mrf.mxu0  ;;  %v7737_v39 = vadd.f32 %v7613_v43, %v3164_v41 }
 0x1a9   : > { %v7671_v2 = vpop.f32.mrf.mxu1  ;;  %8353 = vst [vmem:[#allocation32_spill] sm:$0xff] %v7673_v36  ;;  %v3157_v36 = vadd.f32 %v5705_v8, %v7496_v58  ;;  %v3576_v0 = vadd.f32 %v7587_v24, %v3154_v28  ;;  %v3160_v8 = vadd.f32 %v7599_v20, %v7511_v22  ;;  %v7734_v55 = vadd.f32 %v7611_v52, %v3165_v63  ;;  %v8366_v63 = vld [vmem:[#allocation78_spill] sm:$0xff] }
 0x1aa   : > { %8352 = vst [vmem:[#allocation25_spill] sm:$0xff] %v7671_v2  ;;  %v7677_v7 = vpop.f32.mrf.mxu0  ;;  %v7780_v41 = vadd.f32 %v8366_v63, %v3170_v54 }
 0x1ab   : > { %v7675_v35 = vpop.f32.mrf.mxu1  ;;  %8355 = vst [vmem:[#allocation23_spill] sm:$0xff] %v7677_v7  ;;  %v3579_v58 = vadd.f32 %v7589_v47, %v3157_v36  ;;  %v7715_v36 = vld [vmem:[%s8066_s2] ss:$0 sm:$0xff] }
 0x1ac   : > { %8354 = vst [vmem:[#allocation27_spill] sm:$0xff] %v7675_v35  ;;  %v7681_v57 = vpop.f32.mrf.mxu0  ;;  %v8376_v54 = vld [vmem:[#allocation10_spill] sm:$0xff] }
 0x1ad   : > { %v7679_v21 = vpop.f32.mrf.mxu1  ;;  %8357 = vst [vmem:[#allocation33_spill] sm:$0xff] %v7681_v57  ;;  %v3156_v57 = vadd.f32 %v3005_v46, %v7499_v3  ;;  %v3582_v46 = vadd.f32 %v7601_v23, %v3160_v8 }
 0x1ae   : > { %8356 = vst [vmem:[#allocation28_spill] sm:$0xff] %v7679_v21  ;;  %v7685_v59 = vpop.f32.mrf.mxu0  ;;  %v3577_v21 = vadd.f32 %v7583_v34, %v3155_v13 }
 0x1af   : > { %v7683_v30 = vpop.f32.mrf.mxu1  ;;  %8359 = vst [vmem:[#allocation26_spill] sm:$0xff] %v7685_v59 }
 0x1b0   : > { %8358 = vst [vmem:[#allocation34_spill] sm:$0xff] %v7683_v30  ;;  %v7691_v2 = vpop.f32.mrf.mxu0  ;;  %v3159_v30 = vadd.f32 %v5708_v10, %v7502_v5  ;;  %v3163_v5 = vadd.f32 %v7603_v11, %v7514_v50  ;;  %v7744_v11 = vadd.f32 %v7617_v15, %v3167_v51  ;;  %v3171_v15 = vadd.f32 %v7631_v60, %v7538_v40  ;;  %v8362_v40 = vld [vmem:[#allocation12_spill] sm:$0xff]  ;;  %v8368_v51 = vld [vmem:[#allocation77_spill] sm:$0xff] }
 0x1b1   : > { %v7689_v53 = vpop.f32.mrf.mxu1  ;;  %8360 = vst [vmem:[#allocation37_spill] sm:$0xff] %v7691_v2 }
 0x1b2   : > { %v3567_v7 = vpop.f32.mrf.mxu0  ;;  %v3585_v10 = vadd.f32 %v7605_v62, %v3163_v5  ;;  %v7747_v62 = vadd.f32 %v7621_v14, %v3166_v9  ;;  %v8365_v5 = vld [vmem:[#allocation13_spill] sm:$0xff] }
 0x1b3   : > { %v3145_v35 = vpop.f32.mrf.mxu1 }
 0x1b4   : > { %v3184_v59 = vadd.f32 %v3145_v35, %v7585_v31  ;;  %v5852_v2 = vpop.f32.mrf.mxu0  ;;  %v3162_v35 = vadd.f32 %v7607_v44, %v7517_v61  ;;  %v3580_v31 = vadd.f32 %v7595_v37, %v3158_v6  ;;  %v3583_v61 = vadd.f32 %v7597_v17, %v3161_v38 }
 0x1b5   : > { %v5802_v27 = vpop.f32.mrf.mxu1  ;;  %v3169_v44 = vadd.f32 %v7623_v33, %v7532_v1  ;;  %v3173_v1 = vadd.f32 %v7639_v32, %v7544_v42  ;;  %v3172_v38 = vadd.f32 %v8364_v29, %v8363_v25 }
 0x1b6   : > { %v7704_v13 = vadd.f32 %v3567_v7, %v3184_v59  ;;  %v3967_v3 = vadd.f32 %v5802_v27, %v3577_v21  ;;  %v4229_v22 = vpop.f32.mrf.mxu0  ;;  %v3578_v59 = vadd.f32 %v7591_v49, %v3156_v57  ;;  %v3581_v7 = vadd.f32 %v7593_v45, %v3159_v30 }
 0x1b7   : > { %v3807_v28 = vpop.f32.mrf.mxu1  ;;  %v7731_v45 = vadd.f32 %v7609_v12, %v3162_v35  ;;  %v3168_v12 = vadd.f32 %v7627_v16, %v7535_v48  ;;  %v7777_v35 = vadd.f32 %v8365_v5, %v3171_v15  ;;  %v7792_v9 = vadd.f32 %v8368_v51, %v3172_v38  ;;  %v8375_v15 = vld [vmem:[#allocation5_spill] sm:$0xff]  ;;  %v8380_v38 = vld [vmem:[#allocation20_spill] sm:$0xff]  ;;  %v8384_v51 = vld [vmem:[#allocation19_spill] sm:$0xff] }
 0x1b8   : > { %v4389_v34 = vadd.f32 %v5852_v2, %v3967_v3  ;;  %v3966_v50 = vadd.f32 %v3807_v28, %v3576_v0  ;;  %v5855_v47 = vpop.f32.mrf.mxu0  ;;  %v8361_v0 = vld [vmem:[#allocation9_spill] sm:$0xff]  ;;  %v8367_v28 = vld [vmem:[#allocation14_spill] sm:$0xff] }
 0x1b9   : > { %v5805_v24 = vpop.f32.mrf.mxu1  ;;  %v7768_v6 = vadd.f32 %v8361_v0, %v3169_v44  ;;  %v7771_v60 = vadd.f32 %v8362_v40, %v3168_v12 }
 0x1ba   : > { %v7727_v57 = vadd.f32 %v7715_v36, %v4389_v34  ;;  %v4388_v49 = vadd.f32 %v4229_v22, %v3966_v50  ;;  %v3969_v2 = vadd.f32 %v5805_v24, %v3579_v58  ;;  %v4239_v37 = vpop.f32.mrf.mxu0  ;;  %v7783_v22 = vadd.f32 %v8367_v28, %v3173_v1  ;;  %v8369_v24 = vld [vmem:[#allocation50_spill] sm:$0xff] }
 0x1bb   : > { %v3817_v26 = vpop.f32.mrf.mxu1  ;;  %v3176_v1 = vadd.f32 %v8376_v54, %v8375_v15 }
 0x1bc   : > { %v5118_v19 = vmul.f32 -1.442695, %v7727_v57  ;;  %v7741_v17 = vadd.f32 %v7715_v36, %v4388_v49  ;;  %v4391_v20 = vadd.f32 %v5855_v47, %v3969_v2  ;;  %v3968_v23 = vadd.f32 %v3817_v26, %v3578_v59  ;;  %v5858_v52 = vpop.f32.mrf.mxu0  ;;  %v8370_v47 = vld [vmem:[#allocation16_spill] sm:$0xff]  ;;  %v8371_v2 = vld [vmem:[#allocation58_spill] sm:$0xff] }
 0x1bd   : > { %v5808_v56 = vpop.f32.mrf.mxu1  ;;  %v3175_v49 = vadd.f32 %v8370_v47, %v8369_v24  ;;  %v8372_v26 = vld [vmem:[#allocation18_spill] sm:$0xff]  ;;  %v7831_v24 = vadd.f32 %v8384_v51, %v3176_v1  ;;  %v8385_v47 = vld [vmem:[#allocation31_spill] sm:$0xff] }
 0x1be   : > { %5910 = vpow2.f32 %v5118_v19  ;;  %v5117_v4 = vmul.f32 -1.442695, %v7741_v17  ;;  %v7755_v43 = vadd.f32 %v7715_v36, %v4391_v20  ;;  %v4390_v18 = vadd.f32 %v4239_v37, %v3968_v23  ;;  %v4249_v33 = vpop.f32.mrf.mxu0 }
 0x1bf   : > { %v3971_v14 = vadd.f32 %v5808_v56, %v3581_v7  ;;  %v3827_v48 = vpop.f32.mrf.mxu1  ;;  %v3174_v37 = vadd.f32 %v8372_v26, %v8371_v2 }
 0x1c0   : > { %5912 = vpow2.f32 %v5117_v4  ;;  %v5120_v30 = vmul.f32 -1.442695, %v7755_v43  ;;  %v7765_v16 = vadd.f32 %v7715_v36, %v4390_v18  ;;  %v3970_v21 = vadd.f32 %v3827_v48, %v3580_v31  ;;  %v5861_v27 = vpop.f32.mrf.mxu0  ;;  %v8374_v4 = vld [vmem:[#allocation29_spill] sm:$0xff]  ;;  %v8378_v48 = vld [vmem:[#allocation22_spill] sm:$0xff] }
 0x1c1   : > { %v4393_v42 = vadd.f32 %v5858_v52, %v3971_v14  ;;  %v5811_v32 = vpop.f32.mrf.mxu1  ;;  %v8373_v52 = vld [vmem:[#allocation4_spill] sm:$0xff]  ;;  %v8377_v14 = vld [vmem:[#allocation57_spill] sm:$0xff] }
 0x1c2   : > { %5914 = vpow2.f32 %v5120_v30  ;;  %v5119_v58 = vmul.f32 -1.442695, %v7765_v16  ;;  %v4392_v8 = vadd.f32 %v4249_v33, %v3970_v21  ;;  %v3973_v3 = vadd.f32 %v5811_v32, %v3583_v61  ;;  %v4259_v34 = vpop.f32.mrf.mxu0  ;;  %v8381_v32 = vld [vmem:[#allocation56_spill] sm:$0xff] }
 0x1c3   : > { %v7786_v59 = vadd.f32 %v7715_v36, %v4393_v42  ;;  %v3837_v7 = vpop.f32.mrf.mxu1  ;;  %v3177_v18 = vadd.f32 %v8374_v4, %v8373_v52  ;;  %v3179_v33 = vadd.f32 %v8378_v48, %v8377_v14  ;;  %v7817_v42 = vadd.f32 %v8380_v38, %v3174_v37 }
 0x1c4   : > { %5916 = vpow2.f32 %v5119_v58  ;;  %v7789_v50 = vadd.f32 %v7715_v36, %v4392_v8  ;;  %v4395_v31 = vadd.f32 %v5861_v27, %v3973_v3  ;;  %v3972_v61 = vadd.f32 %v3837_v7, %v3582_v46  ;;  %v5864_v23 = vpop.f32.mrf.mxu0  ;;  %v8382_v27 = vld [vmem:[#allocation24_spill] sm:$0xff] }
 0x1c5   : > { %v5122_v19 = vmul.f32 -1.442695, %v7786_v59  ;;  %v5814_v20 = vpop.f32.mrf.mxu1  ;;  %v3178_v58 = vadd.f32 %v8382_v27, %v8381_v32 }
 0x1c6   : > { %v5121_v44 = vmul.f32 -1.442695, %v7789_v50  ;;  %v7801_v12 = vadd.f32 %v7715_v36, %v4395_v31  ;;  %v4394_v56 = vadd.f32 %v4259_v34, %v3972_v61  ;;  %v3975_v46 = vadd.f32 %v5814_v20, %v3585_v10  ;;  %v4269_v21 = vpop.f32.mrf.mxu0  ;;  %v8379_v10 = vld [vmem:[#allocation17_spill] sm:$0xff]  ;;  %v8383_v31 = vld [vmem:[#allocation30_spill] sm:$0xff] }
 0x1c7   : > { %5918 = vpow2.f32 %v5122_v19  ;;  %v3847_v30 = vpop.f32.mrf.mxu1  ;;  %v7814_v29 = vadd.f32 %v8379_v10, %v3175_v49  ;;  %v7828_v61 = vadd.f32 %v8383_v31, %v3177_v18 }
 0x1c8   : > { %5920 = vpow2.f32 %v5121_v44  ;;  %v5124_v0 = vmul.f32 -1.442695, %v7801_v12  ;;  %v7811_v40 = vadd.f32 %v7715_v36, %v4394_v56  ;;  %v4397_v25 = vadd.f32 %v5864_v23, %v3975_v46  ;;  %v5867_v5 = vpop.f32.mrf.mxu0  ;;  %v8387_v56 = vld [vmem:[#allocation6_spill] sm:$0xff]  ;;  %v8388_v46 = vld [vmem:[#allocation25_spill] sm:$0xff] }
 0x1c9   : > { %v3974_v8 = vadd.f32 %v3847_v30, %v7731_v45  ;;  %v5817_v3 = vpop.f32.mrf.mxu1  ;;  %v7834_v45 = vadd.f32 %v8385_v47, %v3179_v33  ;;  %v3181_v52 = vadd.f32 %v8388_v46, %v8387_v56  ;;  %v8389_v30 = vld [vmem:[#allocation7_spill] sm:$0xff]  ;;  %v8394_v46 = vld [vmem:[#allocation64_spill] sm:$0xff] }
 0x1ca   : > { %5922 = vpow2.f32 %v5124_v0  ;;  %v5123_v63 = vmul.f32 -1.442695, %v7811_v40  ;;  %v7824_v28 = vadd.f32 %v7715_v36, %v4397_v25  ;;  %v3977_v7 = vadd.f32 %v5817_v3, %v7734_v55  ;;  %v4279_v26 = vpop.f32.mrf.mxu0  ;;  %v8386_v55 = vld [vmem:[#allocation21_spill] sm:$0xff] }
 0x1cb   : > { %v5911_v34 = vpop.eup %5910  ;;  %v4396_v49 = vadd.f32 %v4269_v21, %v3974_v8  ;;  %v3857_v2 = vpop.f32.mrf.mxu1  ;;  %v7838_v44 = vadd.f32 %v8386_v55, %v3178_v58  ;;  %v8390_v21 = vld [vmem:[#allocation27_spill] sm:$0xff]  ;;  %v8392_v8 = vld [vmem:[#allocation32_spill] sm:$0xff] }
 0x1cc   : > { %v4556_v37 = vadd.f32 1.0, %v5911_v34  ;;  %5924 = vpow2.f32 %v5123_v63  ;;  %v5126_v19 = vmul.f32 -1.442695, %v7824_v28  ;;  %v4399_v20 = vadd.f32 %v5867_v5, %v3977_v7  ;;  %v5870_v54 = vpop.f32.mrf.mxu0 }
 0x1cd   : > { %v5913_v23 = vpop.eup %5912  ;;  %v7844_v4 = vadd.f32 %v7715_v36, %v4396_v49  ;;  %v3976_v18 = vadd.f32 %v3857_v2, %v7737_v39  ;;  %v5820_v15 = vpop.f32.mrf.mxu1  ;;  %v3180_v0 = vadd.f32 %v8390_v21, %v8389_v30  ;;  %v7862_v3 = vadd.f32 %v8392_v8, %v3181_v52  ;;  %v8393_v49 = vld [vmem:[#allocation23_spill] sm:$0xff]  ;;  %v8395_v52 = vld [vmem:[#allocation28_spill] sm:$0xff] }
 0x1ce   : > { %5926 = vrcp.f32 %v4556_v37  ;;  %v4555_v1 = vadd.f32 1.0, %v5913_v23  ;;  %v7848_v14 = vadd.f32 %v7715_v36, %v4399_v20  ;;  %v3979_v48 = vadd.f32 %v5820_v15, %v7744_v11  ;;  %v4289_v32 = vpop.f32.mrf.mxu0 }
 0x1cf   : > { %v5915_v33 = vpop.eup %5914  ;;  %5928 = vpow2.f32 %v5126_v19  ;;  %v5125_v25 = vmul.f32 -1.442695, %v7844_v4  ;;  %v4398_v10 = vadd.f32 %v4279_v26, %v3976_v18  ;;  %v3867_v38 = vpop.f32.mrf.mxu1  ;;  %v7873_v2 = vadd.f32 %v8393_v49, %v3180_v0 }
 0x1d0   : > { %5930 = vrcp.f32 %v4555_v1  ;;  %v4558_v39 = vadd.f32 1.0, %v5915_v33  ;;  %v5128_v27 = vmul.f32 -1.442695, %v7848_v14  ;;  %v4401_v11 = vadd.f32 %v5870_v54, %v3979_v48  ;;  %v5873_v34 = vpop.f32.mrf.mxu0 }
 0x1d1   : > { %v5917_v58 = vpop.eup %5916  ;;  %5932 = vpow2.f32 %v5125_v25  ;;  %v7865_v5 = vadd.f32 %v7715_v36, %v4398_v10  ;;  %v3978_v63 = vadd.f32 %v3867_v38, %v7747_v62  ;;  %v5823_v7 = vpop.f32.mrf.mxu1  ;;  %v3183_v18 = vadd.f32 %v8395_v52, %v8394_v46  ;;  %v8397_v25 = vld [vmem:[#allocation34_spill] sm:$0xff] }
 0x1d2   : > { %5934 = vrcp.f32 %v4558_v39  ;;  %v4557_v31 = vadd.f32 1.0, %v5917_v58  ;;  %v7869_v51 = vadd.f32 %v7715_v36, %v4401_v11  ;;  %v3981_v47 = vadd.f32 %v5823_v7, %v7768_v6  ;;  %v4299_v20 = vpop.f32.mrf.mxu0  ;;  %v8398_v7 = vld [vmem:[#allocation33_spill] sm:$0xff] }
 0x1d3   : > { %5936 = vpow2.f32 %v5128_v27  ;;  %v5127_v26 = vmul.f32 -1.442695, %v7865_v5  ;;  %v4400_v37 = vadd.f32 %v4289_v32, %v3978_v63  ;;  %v3877_v19 = vpop.f32.mrf.mxu1 }
 0x1d4   : > { %v5919_v23 = vpop.eup %5918  ;;  %5938 = vrcp.f32 %v4557_v31  ;;  %v5130_v62 = vmul.f32 -1.442695, %v7869_v51  ;;  %v4403_v55 = vadd.f32 %v5873_v34, %v3981_v47  ;;  %v3980_v6 = vadd.f32 %v3877_v19, %v7771_v60  ;;  %v5876_v48 = vpop.f32.mrf.mxu0  ;;  %v8396_v60 = vld [vmem:[#allocation63_spill] sm:$0xff] }
 0x1d5   : > { %v5921_v56 = vpop.eup %5920  ;;  %v4560_v15 = vadd.f32 1.0, %v5919_v23  ;;  %5940 = vpow2.f32 %v5127_v26  ;;  %v7887_v54 = vadd.f32 %v7715_v36, %v4400_v37  ;;  %v5826_v1 = vpop.f32.mrf.mxu1  ;;  %v3182_v10 = vadd.f32 %v8397_v25, %v8396_v60  ;;  %v8399_v23 = vld [vmem:[#allocation26_spill] sm:$0xff] }
 0x1d6   : > { %v4559_v33 = vadd.f32 1.0, %v5921_v56  ;;  %5942 = vpow2.f32 %v5130_v62  ;;  %v7890_v30 = vadd.f32 %v7715_v36, %v4403_v55  ;;  %v4402_v21 = vadd.f32 %v4299_v20, %v3980_v6  ;;  %v4309_v27 = vpop.f32.mrf.mxu0 }
 0x1d7   : > { %v5923_v0 = vpop.eup %5922  ;;  %5944 = vrcp.f32 %v4560_v15  ;;  %v5129_v38 = vmul.f32 -1.442695, %v7887_v54  ;;  %v3983_v32 = vadd.f32 %v5826_v1, %v7777_v35  ;;  %v3887_v39 = vpop.f32.mrf.mxu1  ;;  %v7902_v34 = vadd.f32 %v8398_v7, %v3183_v18 }
 0x1d8   : > { %5946 = vrcp.f32 %v4559_v33  ;;  %v4562_v11 = vadd.f32 1.0, %v5923_v0  ;;  %v5132_v58 = vmul.f32 -1.442695, %v7890_v30  ;;  %v7899_v8 = vadd.f32 %v7715_v36, %v4402_v21  ;;  %v5879_v35 = vpop.f32.mrf.mxu0 }
 0x1d9   : > { %v5925_v63 = vpop.eup %5924  ;;  %5948 = vpow2.f32 %v5129_v38  ;;  %v4405_v31 = vadd.f32 %v5876_v48, %v3983_v32  ;;  %v3982_v47 = vadd.f32 %v3887_v39, %v7780_v41  ;;  %v5829_v49 = vpop.f32.mrf.mxu1  ;;  %v7908_v62 = vadd.f32 %v8399_v23, %v3182_v10  ;;  %v8400_v32 = vld [vmem:[#allocation8_spill] sm:$0xff] }
 0x1da   : > { %5950 = vrcp.f32 %v4562_v11  ;;  %v4561_v26 = vadd.f32 1.0, %v5925_v63  ;;  %v5131_v37 = vmul.f32 -1.442695, %v7899_v8  ;;  %v3985_v19 = vadd.f32 %v5829_v49, %v7783_v22  ;;  %v4319_v56 = vpop.f32.mrf.mxu0 }
 0x1db   : > { %v5927_v20 = vpop.eup %5926  ;;  %5952 = vpow2.f32 %v5132_v58  ;;  %v7916_v41 = vadd.f32 %v7715_v36, %v4405_v31  ;;  %v4404_v55 = vadd.f32 %v4309_v27, %v3982_v47  ;;  %v3897_v6 = vpop.f32.mrf.mxu1  ;;  %v7932_v39 = vadd.f32 %v7689_v53, %v8400_v32 }
 0x1dc   : > { %v5929_v46 = vpop.eup %5928  ;;  %v4652_v22 = vmul.f32 %v5927_v20, %v7727_v57  ;;  %5954 = vrcp.f32 %v4561_v26  ;;  %v4407_v52 = vadd.f32 %v5879_v35, %v3985_v19  ;;  %v3984_v18 = vadd.f32 %v3897_v6, %v7792_v9  ;;  %v5882_v0 = vpop.f32.mrf.mxu0 }
 0x1dd   : > { %v5931_v15 = vpop.eup %5930  ;;  %v4564_v1 = vadd.f32 1.0, %v5929_v46  ;;  %5956 = vpow2.f32 %v5131_v37  ;;  %v5134_v48 = vmul.f32 -1.442695, %v7916_v41  ;;  %v7922_v33 = vadd.f32 %v7715_v36, %v4404_v55  ;;  %v5832_v21 = vpop.f32.mrf.mxu1 }
 0x1de   : > { %v5933_v60 = vpop.eup %5932  ;;  %4684 = vst [vmem:[%s7913_s18 + $0x8] sm:$0xff] %v4652_v22  ;;  %v4651_v25 = vmul.f32 %v5931_v15, %v7741_v17  ;;  %v7927_v57 = vadd.f32 %v7715_v36, %v4407_v52  ;;  %v4406_v10 = vadd.f32 %v4319_v56, %v3984_v18  ;;  %v3987_v9 = vadd.f32 %v5832_v21, %v7814_v29  ;;  %v4329_v63 = vpop.f32.mrf.mxu0 }
 0x1df   : > { %v5935_v38 = vpop.eup %5934  ;;  %5958 = vrcp.f32 %v4564_v1  ;;  %v4563_v27 = vadd.f32 1.0, %v5933_v60  ;;  %v5133_v11 = vmul.f32 -1.442695, %v7922_v33  ;;  %v3907_v58 = vpop.f32.mrf.mxu1 }
 0x1e0   : > { %v5937_v7 = vpop.eup %5936  ;;  %4683 = vst [vmem:[%s7913_s18] sm:$0xff] %v4651_v25  ;;  %v4654_v17 = vmul.f32 %v5935_v38, %v7755_v43  ;;  %5960 = vpow2.f32 %v5134_v48  ;;  %v5136_v31 = vmul.f32 -1.442695, %v7927_v57  ;;  %v7939_v29 = vadd.f32 %v7715_v36, %v4406_v10  ;;  %v5885_v37 = vpop.f32.mrf.mxu0 }
 0x1e1   : > { %v5939_v47 = vpop.eup %5938  ;;  %5962 = vrcp.f32 %v4563_v27  ;;  %v4566_v53 = vadd.f32 1.0, %v5937_v7  ;;  %v4409_v49 = vadd.f32 %v5882_v0, %v3987_v9  ;;  %v3986_v35 = vadd.f32 %v3907_v58, %v7817_v42  ;;  %v5835_v26 = vpop.f32.mrf.mxu1 }
 0x1e2   : > { %v5941_v19 = vpop.eup %5940  ;;  %4686 = vst [vmem:[%s7913_s18 + $0x18] sm:$0xff] %v4654_v17  ;;  %v4653_v20 = vmul.f32 %v5939_v47, %v7765_v16  ;;  %5964 = vpow2.f32 %v5133_v11  ;;  %v5135_v43 = vmul.f32 -1.442695, %v7939_v29  ;;  %v3989_v23 = vadd.f32 %v5835_v26, %v7828_v61  ;;  %v4339_v22 = vpop.f32.mrf.mxu0 }
 0x1e3   : > { %v5943_v55 = vpop.eup %5942  ;;  %5966 = vrcp.f32 %v4566_v53  ;;  %v4565_v6 = vadd.f32 1.0, %v5941_v19  ;;  %v7947_v56 = vadd.f32 %v7715_v36, %v4409_v49  ;;  %v4408_v46 = vadd.f32 %v4329_v63, %v3986_v35  ;;  %v3917_v42 = vpop.f32.mrf.mxu1 }
 0x1e4   : > { %v5945_v52 = vpop.eup %5944  ;;  %4685 = vst [vmem:[%s7913_s18 + $0x10] sm:$0xff] %v4653_v20  ;;  %v4568_v18 = vadd.f32 1.0, %v5943_v55  ;;  %5968 = vpow2.f32 %v5136_v31  ;;  %v4411_v16 = vadd.f32 %v5885_v37, %v3989_v23  ;;  %v3988_v15 = vadd.f32 %v3917_v42, %v7831_v24  ;;  %v5888_v60 = vpop.f32.mrf.mxu0 }
 0x1e5   : > { %v5947_v1 = vpop.eup %5946  ;;  %v4656_v61 = vmul.f32 %v5945_v52, %v7786_v59  ;;  %5970 = vrcp.f32 %v4565_v6  ;;  %v5138_v48 = vmul.f32 -1.442695, %v7947_v56  ;;  %v7954_v21 = vadd.f32 %v7715_v36, %v4408_v46  ;;  %v5838_v0 = vpop.f32.mrf.mxu1  ;;  %v8401_v46 = vld [vmem:[#allocation37_spill] sm:$0xff] }
 0x1e6   : > { %v5949_v25 = vpop.eup %5948  ;;  %v4655_v10 = vmul.f32 %v5947_v1, %v7789_v50  ;;  %5972 = vrcp.f32 %v4568_v18  ;;  %v7958_v9 = vadd.f32 %v7715_v36, %v4411_v16  ;;  %v4410_v24 = vadd.f32 %v4339_v22, %v3988_v15  ;;  %v4349_v58 = vpop.f32.mrf.mxu0 }
 0x1e7   : > { %v5951_v38 = vpop.eup %5950  ;;  %4688 = vst [vmem:[%s7913_s18 + $0x28] sm:$0xff] %v4656_v61  ;;  %v4567_v59 = vadd.f32 1.0, %v5949_v25  ;;  %5974 = vpow2.f32 %v5135_v43  ;;  %v5137_v32 = vmul.f32 -1.442695, %v7954_v21  ;;  %v3991_v27 = vadd.f32 %v5838_v0, %v7834_v45  ;;  %v3927_v11 = vpop.f32.mrf.mxu1 }
 0x1e8   : > { %v5953_v63 = vpop.eup %5952  ;;  %4687 = vst [vmem:[%s7913_s18 + $0x20] sm:$0xff] %v4655_v10  ;;  %v4658_v50 = vmul.f32 %v5951_v38, %v7801_v12  ;;  %5976 = vpow2.f32 %v5138_v48  ;;  %v5140_v7 = vmul.f32 -1.442695, %v7958_v9  ;;  %v7967_v17 = vadd.f32 %v7715_v36, %v4410_v24  ;;  %v5891_v35 = vpop.f32.mrf.mxu0 }
 0x1e9   : > { %v5955_v31 = vpop.eup %5954  ;;  %5978 = vrcp.f32 %v4567_v59  ;;  %v4570_v47 = vadd.f32 1.0, %v5953_v63  ;;  %v4413_v53 = vadd.f32 %v5888_v60, %v3991_v27  ;;  %v3990_v49 = vadd.f32 %v3927_v11, %v7838_v44  ;;  %v5841_v45 = vpop.f32.mrf.mxu1 }
 0x1ea   : > { %v5957_v26 = vpop.eup %5956  ;;  %4690 = vst [vmem:[%s7913_s18 + $0x38] sm:$0xff] %v4658_v50  ;;  %v4657_v37 = vmul.f32 %v5955_v31, %v7811_v40  ;;  %5980 = vpow2.f32 %v5137_v32  ;;  %v5139_v12 = vmul.f32 -1.442695, %v7967_v17  ;;  %v3993_v19 = vadd.f32 %v5841_v45, %v7862_v3  ;;  %v4359_v44 = vpop.f32.mrf.mxu0 }
 0x1eb   : > { %5982 = vrcp.f32 %v4570_v47  ;;  %v4569_v20 = vadd.f32 1.0, %v5957_v26  ;;  %v7975_v43 = vadd.f32 %v7715_v36, %v4413_v53  ;;  %v4412_v23 = vadd.f32 %v4349_v58, %v3990_v49  ;;  %v3937_v55 = vpop.f32.mrf.mxu1 }
 0x1ec   : > { %v5959_v6 = vpop.eup %5958  ;;  %v3607_v42 = vadd.f32 %v8401_v46, %v7932_v39  ;;  %4689 = vst [vmem:[%s7913_s18 + $0x30] sm:$0xff] %v4657_v37  ;;  %5984 = vpow2.f32 %v5140_v7  ;;  %v4415_v40 = vadd.f32 %v5891_v35, %v3993_v19  ;;  %v3992_v22 = vadd.f32 %v3937_v55, %v7873_v2  ;;  %v5894_v1 = vpop.f32.mrf.mxu0 }
 0x1ed   : > { %v5961_v52 = vpop.eup %5960  ;;  %v4660_v3 = vmul.f32 %v5959_v6, %v7824_v28  ;;  %5986 = vrcp.f32 %v4569_v20  ;;  %v5142_v18 = vmul.f32 -1.442695, %v7975_v43  ;;  %v7984_v16 = vadd.f32 %v7715_v36, %v4412_v23  ;;  %v5844_v15 = vpop.f32.mrf.mxu1 }
 0x1ee   : > { %v5963_v61 = vpop.eup %5962  ;;  %v4572_v48 = vadd.f32 1.0, %v5961_v52  ;;  %5988 = vpow2.f32 %v5139_v12  ;;  %v7987_v39 = vadd.f32 %v7715_v36, %v4415_v40  ;;  %v4414_v0 = vadd.f32 %v4359_v44, %v3992_v22  ;;  %v4369_v24 = vpop.f32.mrf.mxu0 }
 0x1ef   : > { %v5965_v2 = vpop.eup %5964  ;;  %4692 = vst [vmem:[%s7913_s18 + $0x48] sm:$0xff] %v4660_v3  ;;  %v4659_v28 = vmul.f32 %v5963_v61, %v7844_v4  ;;  %5990 = vpow2.f32 %v5142_v18  ;;  %v5141_v60 = vmul.f32 -1.442695, %v7984_v16  ;;  %v3995_v25 = vadd.f32 %v5844_v15, %v7902_v34  ;;  %v3947_v10 = vpop.f32.mrf.mxu1 }
 0x1f0   : > { %v5967_v38 = vpop.eup %5966  ;;  %5992 = vrcp.f32 %v4572_v48  ;;  %v4571_v59 = vadd.f32 1.0, %v5965_v2  ;;  %v5144_v32 = vmul.f32 -1.442695, %v7987_v39  ;;  %v7995_v27 = vadd.f32 %v7715_v36, %v4414_v0  ;;  %v5897_v50 = vpop.f32.mrf.mxu0 }
 0x1f1   : > { %v5969_v11 = vpop.eup %5968  ;;  %4691 = vst [vmem:[%s7913_s18 + $0x40] sm:$0xff] %v4659_v28  ;;  %v4662_v4 = vmul.f32 %v5967_v38, %v7848_v14  ;;  %5994 = vpow2.f32 %v5141_v60  ;;  %v4417_v58 = vadd.f32 %v5894_v1, %v3995_v25  ;;  %v3994_v63 = vadd.f32 %v3947_v10, %v7908_v62  ;;  %v5847_v34 = vpop.f32.mrf.mxu1 }
 0x1f2   : > { %v5971_v7 = vpop.eup %5970  ;;  %5996 = vrcp.f32 %v4571_v59  ;;  %v4574_v31 = vadd.f32 1.0, %v5969_v11  ;;  %v5143_v47 = vmul.f32 -1.442695, %v7995_v27  ;;  %v3997_v53 = vadd.f32 %v5847_v34, %v3607_v42  ;;  %v4379_v44 = vpop.f32.mrf.mxu0 }
 0x1f3   : > { %v5973_v49 = vpop.eup %5972  ;;  %4694 = vst [vmem:[%s7913_s18 + $0x58] sm:$0xff] %v4662_v4  ;;  %v4661_v45 = vmul.f32 %v5971_v7, %v7865_v5  ;;  %5998 = vpow2.f32 %v5144_v32  ;;  %v8004_v14 = vadd.f32 %v7715_v36, %v4417_v58  ;;  %v4416_v35 = vadd.f32 %v4369_v24, %v3994_v63  ;;  %v3957_v62 = vpop.f32.mrf.mxu1 }
 0x1f4   : > { %v5975_v26 = vpop.eup %5974  ;;  %v4664_v37 = vmul.f32 %v5973_v49, %v7869_v51  ;;  %6000 = vrcp.f32 %v4574_v31  ;;  %v4419_v12 = vadd.f32 %v5897_v50, %v3997_v53  ;;  %v3996_v19 = vadd.f32 %v3957_v62, %v7704_v13 }
 0x1f5   : > { %v5977_v20 = vpop.eup %5976  ;;  %4693 = vst [vmem:[%s7913_s18 + $0x50] sm:$0xff] %v4661_v45  ;;  %v4573_v23 = vadd.f32 1.0, %v5975_v26  ;;  %6002 = vpow2.f32 %v5143_v47  ;;  %v5146_v5 = vmul.f32 -1.442695, %v8004_v14  ;;  %v8011_v55 = vadd.f32 %v7715_v36, %v4416_v35 }
 0x1f6   : > { %v5979_v6 = vpop.eup %5978  ;;  %4696 = vst [vmem:[%s7913_s18 + $0x68] sm:$0xff] %v4664_v37  ;;  %v4576_v46 = vadd.f32 1.0, %v5977_v20  ;;  %v8015_v51 = vadd.f32 %v7715_v36, %v4419_v12  ;;  %v4418_v42 = vadd.f32 %v4379_v44, %v3996_v19 }
 0x1f7   : > { %v5981_v40 = vpop.eup %5980  ;;  %v4663_v13 = vmul.f32 %v5979_v6, %v7887_v54  ;;  %6004 = vrcp.f32 %v4573_v23  ;;  %v5145_v22 = vmul.f32 -1.442695, %v8011_v55 }
 0x1f8   : > { %v5983_v52 = vpop.eup %5982  ;;  %6006 = vrcp.f32 %v4576_v46  ;;  %v4575_v3 = vadd.f32 1.0, %v5981_v40  ;;  %v8020_v18 = vadd.f32 %v7715_v36, %v4418_v42  ;;  %v5148_v61 = vmul.f32 -1.442695, %v8015_v51 }
 0x1f9   : > { %v5985_v15 = vpop.eup %5984  ;;  %4695 = vst [vmem:[%s7913_s18 + $0x60] sm:$0xff] %v4663_v13  ;;  %v4666_v1 = vmul.f32 %v5983_v52, %v7890_v30  ;;  %6008 = vpow2.f32 %v5146_v5 }
 0x1fa   : > { %v5987_v48 = vpop.eup %5986  ;;  %6010 = vrcp.f32 %v4575_v3  ;;  %v4578_v54 = vadd.f32 1.0, %v5985_v15  ;;  %v5147_v60 = vmul.f32 -1.442695, %v8020_v18 }
 0x1fb   : > { %v5989_v0 = vpop.eup %5988  ;;  %4698 = vst [vmem:[%s7913_s18 + $0x78] sm:$0xff] %v4666_v1  ;;  %v4665_v2 = vmul.f32 %v5987_v48, %v7899_v8  ;;  %6012 = vpow2.f32 %v5145_v22 }
 0x1fc   : > { %v5991_v28 = vpop.eup %5990  ;;  %6014 = vrcp.f32 %v4578_v54  ;;  %v4577_v36 = vadd.f32 1.0, %v5989_v0 }
 0x1fd   : > { %v5993_v25 = vpop.eup %5992  ;;  %4697 = vst [vmem:[%s7913_s18 + $0x70] sm:$0xff] %v4665_v2  ;;  %v4580_v30 = vadd.f32 1.0, %v5991_v28  ;;  %6016 = vpow2.f32 %v5148_v61 }
 0x1fe   : > { %v5995_v10 = vpop.eup %5994  ;;  %v4668_v24 = vmul.f32 %v5993_v25, %v7916_v41  ;;  %6018 = vrcp.f32 %v4577_v36 }
 0x1ff   : > { %v5997_v38 = vpop.eup %5996  ;;  %6020 = vrcp.f32 %v4580_v30  ;;  %v4579_v8 = vadd.f32 1.0, %v5995_v10 }
 0x200   : > { %v5999_v59 = vpop.eup %5998  ;;  %4700 = vst [vmem:[%s7913_s18 + $0x88] sm:$0xff] %v4668_v24  ;;  %v4667_v32 = vmul.f32 %v5997_v38, %v7922_v33  ;;  %6022 = vpow2.f32 %v5147_v60 }
 0x201   : > { %v6001_v11 = vpop.eup %6000  ;;  %6024 = vrcp.f32 %v4579_v8  ;;  %v4582_v4 = vadd.f32 1.0, %v5999_v59 }
 0x202   : > { %v6003_v58 = vpop.eup %6002  ;;  %4699 = vst [vmem:[%s7913_s18 + $0x80] sm:$0xff] %v4667_v32  ;;  %v4670_v63 = vmul.f32 %v6001_v11, %v7927_v57 }
 0x203   : > { %6026 = vrcp.f32 %v4582_v4  ;;  %v4581_v41 = vadd.f32 1.0, %v6003_v58 }
 0x204   : > { %v6005_v34 = vpop.eup %6004  ;;  %4702 = vst [vmem:[%s7913_s18 + $0x98] sm:$0xff] %v4670_v63 }
 0x205   : > { %v6007_v50 = vpop.eup %6006  ;;  %v4669_v7 = vmul.f32 %v6005_v34, %v7939_v29  ;;  %6028 = vrcp.f32 %v4581_v41 }
 0x206   : > { %v6009_v33 = vpop.eup %6008  ;;  %v4672_v31 = vmul.f32 %v6007_v50, %v7947_v56 }
 0x207   : > { %v6011_v47 = vpop.eup %6010  ;;  %4701 = vst [vmem:[%s7913_s18 + $0x90] sm:$0xff] %v4669_v7  ;;  %v4584_v53 = vadd.f32 1.0, %v6009_v33 }
 0x208   : > { %v6013_v49 = vpop.eup %6012  ;;  %4704 = vst [vmem:[%s7913_s18 + $0xa8] sm:$0xff] %v4672_v31  ;;  %v4671_v57 = vmul.f32 %v6011_v47, %v7954_v21 }
 0x209   : > { %v6015_v45 = vpop.eup %6014  ;;  %6030 = vrcp.f32 %v4584_v53  ;;  %v4583_v35 = vadd.f32 1.0, %v6013_v49 }
 0x20a   : > { %v6017_v62 = vpop.eup %6016  ;;  %4703 = vst [vmem:[%s7913_s18 + $0xa0] sm:$0xff] %v4671_v57  ;;  %v4674_v29 = vmul.f32 %v6015_v45, %v7958_v9 }
 0x20b   : > { %v6019_v26 = vpop.eup %6018  ;;  %6032 = vrcp.f32 %v4583_v35  ;;  %v4586_v56 = vadd.f32 1.0, %v6017_v62 }
 0x20c   : > { %v6021_v37 = vpop.eup %6020  ;;  %4706 = vst [vmem:[%s7913_s18 + $0xb8] sm:$0xff] %v4674_v29  ;;  %v4673_v12 = vmul.f32 %v6019_v26, %v7967_v17 }
 0x20d   : > { %v6023_v21 = vpop.eup %6022  ;;  %v4676_v19 = vmul.f32 %v6021_v37, %v7975_v43  ;;  %6034 = vrcp.f32 %v4586_v56 }
 0x20e   : > { %v6025_v20 = vpop.eup %6024  ;;  %4705 = vst [vmem:[%s7913_s18 + $0xb0] sm:$0xff] %v4673_v12  ;;  %v4585_v23 = vadd.f32 1.0, %v6023_v21 }
 0x20f   : > { %4708 = vst [vmem:[%s7913_s18 + $0xc8] sm:$0xff] %v4676_v19  ;;  %v4675_v9 = vmul.f32 %v6025_v20, %v7984_v16 }
 0x210   : > { %v6027_v5 = vpop.eup %6026  ;;  %6036 = vrcp.f32 %v4585_v23 }
 0x211   : > { %4707 = vst [vmem:[%s7913_s18 + $0xc0] sm:$0xff] %v4675_v9  ;;  %v4678_v44 = vmul.f32 %v6027_v5, %v7987_v39 }
 0x212   : > { %v6029_v17 = vpop.eup %6028 }
 0x213   : > { %4710 = vst [vmem:[%s7913_s18 + $0xd8] sm:$0xff] %v4678_v44  ;;  %v4677_v43 = vmul.f32 %v6029_v17, %v7995_v27 }
 0x215   : > { %4709 = vst [vmem:[%s7913_s18 + $0xd0] sm:$0xff] %v4677_v43 }
 0x216   : > { %v6031_v6 = vpop.eup %6030 }
 0x217   : > { %v4680_v46 = vmul.f32 %v6031_v6, %v8004_v14 }
 0x218   : > { %v6033_v42 = vpop.eup %6032 }
 0x219   : > { %4712 = vst [vmem:[%s7913_s18 + $0xe8] sm:$0xff] %v4680_v46  ;;  %v4679_v40 = vmul.f32 %v6033_v42, %v8011_v55 }
 0x21a   : > { %v6035_v16 = vpop.eup %6034 }
 0x21b   : > { %4711 = vst [vmem:[%s7913_s18 + $0xe0] sm:$0xff] %v4679_v40  ;;  %v4682_v13 = vmul.f32 %v6035_v16, %v8015_v51 }
 0x21d   : > { %v6037_v22 = vpop.eup %6036  ;;  %4714 = vst [vmem:[%s7913_s18 + $0xf8] sm:$0xff] %v4682_v13 }
 0x21e   : > { %v4681_v39 = vmul.f32 %v6037_v22, %v8020_v18 }
 0x220   : > { %4713 = vst [vmem:[%s7913_s18 + $0xf0] sm:$0xff] %v4681_v39 }
 0x221 PF: > { %s13_s12 = sadd.s32 1, %s6044_s12  }
 0x222   : > { %p10_p5 = scmp.ge.s32.totalorder %s13_s12, 4  }
 0x224   :  { %12 = sbr.rel (!%p10_p5) target bundleno = 1 (0x1), region = 70 }

</bundles_post_ra>
